<compile_context>
chip_gen: v6e
topology: v6e:2x2x1
jax: 0.10.0
libtpu: 0.0.40
codegen_flags: <defaults>
</compile_context>

<pallas_src>
import functools

import numpy as np
import jax
import jax.numpy as jnp
from jax import lax
from jax.experimental import pallas as pl
from jax.experimental.pallas import tpu as pltpu


_VMEM = pl.BlockSpec(memory_space=pltpu.MemorySpace.VMEM)
_CPARAMS = pltpu.CompilerParams(vmem_limit_bytes=32 * 1024 * 1024)
_K = 5  # conv kernel size (hard-coded in the PyTorch module)


def _round_up(v, m):
    return -(-v // m) * m


# ----------------------------------------------------------------------------
# Fused Pallas kernel
# ----------------------------------------------------------------------------
def _net_kernel(x_ref, w1_ref, b1_ref, w2_ref, b2_ref,
                f1w_ref, f1b_ref, f3w_ref, f3b_ref, o_ref,
                *, n, q1, hp2, discrete):
    """All-in-VMEM fused forward pass.

    x_ref : (4, (H//4)*n, W*C)  bf16  input rows split by (row mod 4); each
                                       plane's rows ordered (row-major, image-
                                       minor), lanes (w-major, channel-minor).
    w1_ref: (5, W*C, 2*L1)      bf16  banded conv1 weights (x/255 folded in),
                                       one slab per kernel row kh; columns are
                                       [even-ow block | odd-ow block], each
                                       zero-padded to L1 (multiple of 128).
    b1_ref: (1, 2*L1)           f32   conv1 bias tiled per output column.
    w2_ref: (5, L1, 2*L2)       bf16  banded conv2 weights (same layout).
    b2_ref: (1, 2*L2)           f32
    f1w_ref:(hp2, L2, hidden)   bf16  fc1 weight with rows permuted host-side
                                       so the pooled-conv2 layout produced here
                                       multiplies it directly (NCHW flatten
                                       moved into a one-time permutation).
    f1b_ref:(1, hidden)         f32
    f3w_ref:(hidden, ncls)      bf16
    f3b_ref:(1, ncls)           f32
    o_ref : (n, ncls)           f32
    """
    f32 = jnp.float32
    bf16 = jnp.bfloat16
    half1 = w1_ref.shape[2] // 2          # L1 (multiple of 128)
    half2 = w2_ref.shape[2] // 2          # L2 (multiple of 128)

    # ---- conv1 + bias + ReLU + 2x2 max-pool --------------------------------
    # y1[a] = pooled rows whose pooled-row index is congruent to a (mod 2):
    # exactly the row-parity split conv2 needs for its own GEMMs.
    y1 = []
    for a in range(2):                    # pooled-row parity
        zrow = []
        for b in range(2):                # row inside the 2x2 pool window
            acc = None
            for kh in range(_K):
                t = 2 * a + b + kh        # absolute input row = 4*q + t
                lhs = x_ref[t % 4, (t // 4) * n:(t // 4 + q1) * n, :]
                d = jnp.dot(lhs, w1_ref[kh], preferred_element_type=f32)
                acc = d if acc is None else acc + d
            zrow.append(acc)
        z = jnp.maximum(zrow[0], zrow[1]) + b1_ref[...]       # pool rows + bias
        z = jnp.maximum(z, 0.0)                               # ReLU
        y1.append(jnp.maximum(z[:, :half1], z[:, half1:]).astype(bf16))  # pool cols

    # ---- conv2 + bias + ReLU + 2x2 max-pool --------------------------------
    zrow = []
    for b in range(2):                    # row inside the 2x2 pool window
        acc = None
        for kh in range(_K):
            t = b + kh                    # y1 row = 2*ohp2 + t
            lhs = y1[t % 2][(t // 2) * n:(t // 2 + hp2) * n, :]
            d = jnp.dot(lhs, w2_ref[kh], preferred_element_type=f32)
            acc = d if acc is None else acc + d
        zrow.append(acc)
    z = jnp.maximum(zrow[0], zrow[1]) + b2_ref[...]
    z = jnp.maximum(z, 0.0)
    p2 = jnp.maximum(z[:, :half2], z[:, half2:]).astype(bf16)   # (hp2*n, L2)

    # ---- fc1 + ReLU (weight rows pre-permuted host-side) -------------------
    h = None
    for i in range(hp2):
        d = jnp.dot(p2[i * n:(i + 1) * n, :], f1w_ref[i],
                    preferred_element_type=f32)
        h = d if h is None else h + d
    h = jnp.maximum(h + f1b_ref[...], 0.0)

    # ---- fc3 (+ optional softmax) -------------------------------------------
    out = jnp.dot(h.astype(bf16), f3w_ref[...],
                  preferred_element_type=f32) + f3b_ref[...]
    if discrete:
        out = out - jnp.max(out, axis=1, keepdims=True)
        e = jnp.exp(out)
        out = e / jnp.sum(e, axis=1, keepdims=True)
    o_ref[...] = out


# ----------------------------------------------------------------------------
# pallas_call wrapper
# ----------------------------------------------------------------------------
def _net_pallas(xp, kp, *, n, discrete):
    h = (xp.shape[1] // n) * 4
    q1 = (h - (_K - 1)) // 4              # pooled conv1 rows per parity plane
    hp2 = kp["fc1_w"].shape[0]            # pooled conv2 rows
    ncls = kp["fc3_w"].shape[1]
    kernel = functools.partial(_net_kernel, n=n, q1=q1, hp2=hp2,
                               discrete=discrete)
    return pl.pallas_call(
        kernel,
        out_shape=jax.ShapeDtypeStruct((n, ncls), jnp.float32),
        in_specs=[_VMEM] * 9,
        out_specs=_VMEM,
        compiler_params=_CPARAMS,
    )(xp, kp["band1"], kp["b1"], kp["band2"], kp["b2"],
      kp["fc1_w"], kp["fc1_b"], kp["fc3_w"], kp["fc3_b"])


@functools.partial(jax.jit, static_argnames=("discrete",))
def net_forward(kp, x, discrete=False):
    """Matches Net.forward semantics (x/255 folded into conv1 weights)."""
    x = jnp.asarray(x, jnp.float32)
    if x.ndim < 4:
        x = x[None]                                    # torch.unsqueeze(x, 0)
    n, c, h, w = x.shape
    # (N,C,H,W) -> (H, N, W*C) with lanes (w-major, c-minor), then split rows
    # into the 4 (row mod 4) planes with rows ordered (row-major, image-minor).
    xt = jnp.transpose(x, (2, 0, 3, 1)).reshape(h, n, w * c)
    xp = jnp.stack([xt[p::4] for p in range(4)], axis=0)
    xp = xp.reshape(4, (h // 4) * n, w * c).astype(jnp.bfloat16)
    return _net_pallas(xp, kp, n=n, discrete=discrete)


# ----------------------------------------------------------------------------
# One-time host-side weight preparation
# ----------------------------------------------------------------------------
def prepare_params(params, image_hw):
    """Build banded conv GEMM weights (pool-phase column blocks padded to 128
    lanes), fold x/255 into conv1, permute fc1 rows to the kernel's pooled
    layout, cast GEMM operands to bf16."""
    h, w = image_hw
    assert h % 4 == 0 and w % 2 == 0, "image size must be divisible by 4 / 2"

    w1 = np.asarray(params["conv1_w"], np.float32) / 255.0     # fold x/255
    w2 = np.asarray(params["conv2_w"], np.float32)
    c1out, cin = w1.shape[0], w1.shape[1]
    c2out = w2.shape[0]
    assert w1.shape[2:] == (_K, _K) and w2.shape[2:] == (_K, _K)
    assert w2.shape[1] == c1out

    wout1 = w - (_K - 1)            # conv1 output width
    wp1 = wout1 // 2                # pooled width (== conv2 input width)
    hp1 = (h - (_K - 1)) // 2       # pooled height
    wout2 = wp1 - (_K - 1)          # conv2 output width
    wp2 = wout2 // 2                # pooled width
    hp2 = (hp1 - (_K - 1)) // 2     # pooled height
    assert hp1 % 2 == 0 and wout1 % 2 == 0 and wout2 % 2 == 0

    l1 = _round_up(wp1 * c1out, 128)
    l2 = _round_up(wp2 * c2out, 128)

    # banded conv1 weight: one (W*Cin, 2*L1) slab per kernel row kh;
    # columns = [even-ow | odd-ow] pool-phase blocks, (ow//2)-major, cout-minor.
    band1 = np.zeros((_K, w * cin, 2 * l1), np.float32)
    for kh in range(_K):
        for kw in range(_K):
            blk = w1[:, :, kh, kw].T                           # (cin, c1out)
            for ow in range(wout1):
                r0 = (ow + kw) * cin
                c0 = (ow % 2) * l1 + (ow // 2) * c1out
                band1[kh, r0:r0 + cin, c0:c0 + c1out] = blk
    b1t = np.zeros((1, 2 * l1), np.float32)
    b1t[0, :wp1 * c1out] = np.tile(np.asarray(params["conv1_b"], np.float32), wp1)
    b1t[0, l1:l1 + wp1 * c1out] = b1t[0, :wp1 * c1out]

    # banded conv2 weight: rows indexed by the pooled conv1 lane layout.
    band2 = np.zeros((_K, l1, 2 * l2), np.float32)
    for kh in range(_K):
        for kw in range(_K):
            blk = w2[:, :, kh, kw].T                           # (c1out, c2out)
            for ow in range(wout2):
                r0 = (ow + kw) * c1out
                c0 = (ow % 2) * l2 + (ow // 2) * c2out
                band2[kh, r0:r0 + c1out, c0:c0 + c2out] = blk
    b2t = np.zeros((1, 2 * l2), np.float32)
    b2t[0, :wp2 * c2out] = np.tile(np.asarray(params["conv2_b"], np.float32), wp2)
    b2t[0, l2:l2 + wp2 * c2out] = b2t[0, :wp2 * c2out]

    # fc1: (hidden, c2out*hp2*wp2) NCHW-flat -> (hp2, L2, hidden): pure
    # permutation + zero padding, no inflation.
    fc1 = np.asarray(params["fc1_w"], np.float32)
    hidden = fc1.shape[0]
    assert fc1.shape[1] == c2out * hp2 * wp2
    fc1r = fc1.reshape(hidden, c2out, hp2, wp2)
    fc1p = np.zeros((hp2, l2, hidden), np.float32)
    fc1p[:, :wp2 * c2out, :] = np.transpose(fc1r, (2, 3, 1, 0)).reshape(
        hp2, wp2 * c2out, hidden)

    fc3 = np.asarray(params["fc3_w"], np.float32).T            # (hidden, ncls)

    bf16, f32 = jnp.bfloat16, jnp.float32
    return {
        "band1": jnp.asarray(band1, bf16),
        "b1": jnp.asarray(b1t, f32),
        "band2": jnp.asarray(band2, bf16),
        "b2": jnp.asarray(b2t, f32),
        "fc1_w": jnp.asarray(fc1p, bf16),
        "fc1_b": jnp.asarray(np.asarray(params["fc1_b"], np.float32).reshape(1, -1), f32),
        "fc3_w": jnp.asarray(fc3, bf16),
        "fc3_b": jnp.asarray(np.asarray(params["fc3_b"], np.float32).reshape(1, -1), f32),
    }


# ----------------------------------------------------------------------------
# Pure-JAX f32 reference (for correctness check only)
# ----------------------------------------------------------------------------
def net_reference(params, x, *, discrete=False):
    x = jnp.asarray(x, jnp.float32) / 255.0
    x = jnp.transpose(x, (0, 2, 3, 1))

    def conv(a, wgt, b):
        w_hwio = jnp.transpose(wgt, (2, 3, 1, 0))
        y = lax.conv_general_dilated(a, w_hwio, (1, 1), "VALID",
                                     dimension_numbers=("NHWC", "HWIO", "NHWC"))
        return y + b.reshape(1, 1, 1, -1)

    def pool(a):
        return lax.reduce_window(a, -jnp.inf, lax.max,
                                 (1, 2, 2, 1), (1, 2, 2, 1), "VALID")

    y = pool(jax.nn.relu(conv(x, params["conv1_w"], params["conv1_b"])))
    y = pool(jax.nn.relu(conv(y, params["conv2_w"], params["conv2_b"])))
    flat = jnp.transpose(y, (0, 3, 1, 2)).reshape(y.shape[0], -1)
    h = jax.nn.relu(flat @ params["fc1_w"].T + params["fc1_b"])
    out = h @ params["fc3_w"].T + params["fc3_b"]
    if discrete:
        out = jax.nn.softmax(out, axis=1)
    return out


# ----------------------------------------------------------------------------
if __name__ == "__main__":
    N, C, H, W = 2, 3, 32, 32
    n_classes, hidden = 10, 120

    # size after conv(5)->pool(2)->conv(5)->pool(2), as ComputeFFSize does
    hp = ((H - 4) // 2 - 4) // 2
    wp = ((W - 4) // 2 - 4) // 2
    flat_size = 16 * hp * wp

    key = jax.random.PRNGKey(0)
    keys = jax.random.split(key, 9)

    def init_u(k, shape, fan_in):  # PyTorch-style uniform(-1/sqrt(fan), 1/sqrt(fan))
        bound = 1.0 / (fan_in ** 0.5)
        return jax.random.uniform(k, shape, jnp.float32, -bound, bound)

    params = {
        "conv1_w": init_u(keys[0], (6, C, 5, 5), C * 25),
        "conv1_b": init_u(keys[1], (6,), C * 25),
        "conv2_w": init_u(keys[2], (16, 6, 5, 5), 6 * 25),
        "conv2_b": init_u(keys[3], (16,), 6 * 25),
        "fc1_w": init_u(keys[4], (hidden, flat_size), flat_size),
        "fc1_b": init_u(keys[5], (hidden,), flat_size),
        "fc3_w": init_u(keys[6], (n_classes, hidden), hidden),
        "fc3_b": init_u(keys[7], (n_classes,), hidden),
    }
    kparams = prepare_params(params, (H, W))   # one-time weight prep

    # raw "image" input in [0, 255], NCHW like the torch module expects
    x = jax.random.uniform(keys[8], (N, C, H, W), jnp.float32, 0.0, 255.0)

    out = net_forward(kparams, x, discrete=False)
    out = jax.block_until_ready(out)
    assert out.shape == (N, n_classes)
    ref = net_reference(params, x, discrete=False)
    if not jnp.allclose(out, ref, rtol=5e-2, atol=2e-2):
        raise AssertionError("Pallas output does not match JAX reference")

    # discrete=True path (softmax); bf16 GEMM operands -> loosened tolerance
    out_d = jax.block_until_ready(net_forward(kparams, x, discrete=True))
    ref_d = net_reference(params, x, discrete=True)
    if not jnp.allclose(out_d, ref_d, rtol=5e-2, atol=1e-2):
        raise AssertionError("Pallas softmax output does not match JAX reference")

    print("KERNEL_OK")
</pallas_src>

<mosaic_0001>
module attributes {stable_mosaic.version = 11 : i64} {
  func.func @_net_kernel(%arg0: memref<4x16x96xbf16, #tpu.memory_space<vmem>>, %arg1: memref<5x96x256xbf16, #tpu.memory_space<vmem>>, %arg2: memref<1x256xf32, #tpu.memory_space<vmem>>, %arg3: memref<5x128x256xbf16, #tpu.memory_space<vmem>>, %arg4: memref<1x256xf32, #tpu.memory_space<vmem>>, %arg5: memref<5x128x120xbf16, #tpu.memory_space<vmem>>, %arg6: memref<1x120xf32, #tpu.memory_space<vmem>>, %arg7: memref<120x10xbf16, #tpu.memory_space<vmem>>, %arg8: memref<1x10xf32, #tpu.memory_space<vmem>>, %arg9: memref<2x10xf32, #tpu.memory_space<vmem>>) attributes {dimension_semantics = [], scalar_prefetch = 0 : i64, scratch_operands = 0 : i64, tpu.core_type = #tpu.core_type<tc>} {
    %c0 = arith.constant 0 : index
    %c0_0 = arith.constant 0 : index
    %c0_1 = arith.constant 0 : index
    %0 = vector.load %arg0[%c0, %c0_0, %c0_1] : memref<4x16x96xbf16, #tpu.memory_space<vmem>>, vector<1x14x96xbf16>
    %1 = vector.shape_cast %0 : vector<1x14x96xbf16> to vector<14x96xbf16>
    %c0_2 = arith.constant 0 : index
    %c0_3 = arith.constant 0 : index
    %c0_4 = arith.constant 0 : index
    %2 = vector.load %arg1[%c0_2, %c0_3, %c0_4] : memref<5x96x256xbf16, #tpu.memory_space<vmem>>, vector<1x96x256xbf16>
    %3 = vector.shape_cast %2 : vector<1x96x256xbf16> to vector<96x256xbf16>
    %cst = arith.constant dense<0.000000e+00> : vector<14x256xf32>
    %4 = tpu.matmul %1, %3, %cst {dimension_numbers = #tpu.dot_dimension_numbers<[1], [0], [0], [1], [0, 0, 1, 1], [], []>} : vector<14x96xbf16>, vector<96x256xbf16>, vector<14x256xf32> -> vector<14x256xf32>
    %c1 = arith.constant 1 : index
    %c0_5 = arith.constant 0 : index
    %c0_6 = arith.constant 0 : index
    %5 = vector.load %arg0[%c1, %c0_5, %c0_6] : memref<4x16x96xbf16, #tpu.memory_space<vmem>>, vector<1x14x96xbf16>
    %6 = vector.shape_cast %5 : vector<1x14x96xbf16> to vector<14x96xbf16>
    %c1_7 = arith.constant 1 : index
    %c0_8 = arith.constant 0 : index
    %c0_9 = arith.constant 0 : index
    %7 = vector.load %arg1[%c1_7, %c0_8, %c0_9] : memref<5x96x256xbf16, #tpu.memory_space<vmem>>, vector<1x96x256xbf16>
    %8 = vector.shape_cast %7 : vector<1x96x256xbf16> to vector<96x256xbf16>
    %cst_10 = arith.constant dense<0.000000e+00> : vector<14x256xf32>
    %9 = tpu.matmul %6, %8, %cst_10 {dimension_numbers = #tpu.dot_dimension_numbers<[1], [0], [0], [1], [0, 0, 1, 1], [], []>} : vector<14x96xbf16>, vector<96x256xbf16>, vector<14x256xf32> -> vector<14x256xf32>
    %10 = arith.addf %4, %9 : vector<14x256xf32>
    %c2 = arith.constant 2 : index
    %c0_11 = arith.constant 0 : index
    %c0_12 = arith.constant 0 : index
    %11 = vector.load %arg0[%c2, %c0_11, %c0_12] : memref<4x16x96xbf16, #tpu.memory_space<vmem>>, vector<1x14x96xbf16>
    %12 = vector.shape_cast %11 : vector<1x14x96xbf16> to vector<14x96xbf16>
    %c2_13 = arith.constant 2 : index
    %c0_14 = arith.constant 0 : index
    %c0_15 = arith.constant 0 : index
    %13 = vector.load %arg1[%c2_13, %c0_14, %c0_15] : memref<5x96x256xbf16, #tpu.memory_space<vmem>>, vector<1x96x256xbf16>
    %14 = vector.shape_cast %13 : vector<1x96x256xbf16> to vector<96x256xbf16>
    %cst_16 = arith.constant dense<0.000000e+00> : vector<14x256xf32>
    %15 = tpu.matmul %12, %14, %cst_16 {dimension_numbers = #tpu.dot_dimension_numbers<[1], [0], [0], [1], [0, 0, 1, 1], [], []>} : vector<14x96xbf16>, vector<96x256xbf16>, vector<14x256xf32> -> vector<14x256xf32>
    %16 = arith.addf %10, %15 : vector<14x256xf32>
    %c3 = arith.constant 3 : index
    %c0_17 = arith.constant 0 : index
    %c0_18 = arith.constant 0 : index
    %17 = vector.load %arg0[%c3, %c0_17, %c0_18] : memref<4x16x96xbf16, #tpu.memory_space<vmem>>, vector<1x14x96xbf16>
    %18 = vector.shape_cast %17 : vector<1x14x96xbf16> to vector<14x96xbf16>
    %c3_19 = arith.constant 3 : index
    %c0_20 = arith.constant 0 : index
    %c0_21 = arith.constant 0 : index
    %19 = vector.load %arg1[%c3_19, %c0_20, %c0_21] : memref<5x96x256xbf16, #tpu.memory_space<vmem>>, vector<1x96x256xbf16>
    %20 = vector.shape_cast %19 : vector<1x96x256xbf16> to vector<96x256xbf16>
    %cst_22 = arith.constant dense<0.000000e+00> : vector<14x256xf32>
    %21 = tpu.matmul %18, %20, %cst_22 {dimension_numbers = #tpu.dot_dimension_numbers<[1], [0], [0], [1], [0, 0, 1, 1], [], []>} : vector<14x96xbf16>, vector<96x256xbf16>, vector<14x256xf32> -> vector<14x256xf32>
    %22 = arith.addf %16, %21 : vector<14x256xf32>
    %c0_23 = arith.constant 0 : index
    %c2_24 = arith.constant 2 : index
    %c0_25 = arith.constant 0 : index
    %23 = vector.load %arg0[%c0_23, %c2_24, %c0_25] : memref<4x16x96xbf16, #tpu.memory_space<vmem>>, vector<1x14x96xbf16>
    %24 = vector.shape_cast %23 : vector<1x14x96xbf16> to vector<14x96xbf16>
    %c4 = arith.constant 4 : index
    %c0_26 = arith.constant 0 : index
    %c0_27 = arith.constant 0 : index
    %25 = vector.load %arg1[%c4, %c0_26, %c0_27] : memref<5x96x256xbf16, #tpu.memory_space<vmem>>, vector<1x96x256xbf16>
    %26 = vector.shape_cast %25 : vector<1x96x256xbf16> to vector<96x256xbf16>
    %cst_28 = arith.constant dense<0.000000e+00> : vector<14x256xf32>
    %27 = tpu.matmul %24, %26, %cst_28 {dimension_numbers = #tpu.dot_dimension_numbers<[1], [0], [0], [1], [0, 0, 1, 1], [], []>} : vector<14x96xbf16>, vector<96x256xbf16>, vector<14x256xf32> -> vector<14x256xf32>
    %28 = arith.addf %22, %27 : vector<14x256xf32>
    %c1_29 = arith.constant 1 : index
    %c0_30 = arith.constant 0 : index
    %c0_31 = arith.constant 0 : index
    %29 = vector.load %arg0[%c1_29, %c0_30, %c0_31] : memref<4x16x96xbf16, #tpu.memory_space<vmem>>, vector<1x14x96xbf16>
    %30 = vector.shape_cast %29 : vector<1x14x96xbf16> to vector<14x96xbf16>
    %c0_32 = arith.constant 0 : index
    %c0_33 = arith.constant 0 : index
    %c0_34 = arith.constant 0 : index
    %31 = vector.load %arg1[%c0_32, %c0_33, %c0_34] : memref<5x96x256xbf16, #tpu.memory_space<vmem>>, vector<1x96x256xbf16>
    %32 = vector.shape_cast %31 : vector<1x96x256xbf16> to vector<96x256xbf16>
    %cst_35 = arith.constant dense<0.000000e+00> : vector<14x256xf32>
    %33 = tpu.matmul %30, %32, %cst_35 {dimension_numbers = #tpu.dot_dimension_numbers<[1], [0], [0], [1], [0, 0, 1, 1], [], []>} : vector<14x96xbf16>, vector<96x256xbf16>, vector<14x256xf32> -> vector<14x256xf32>
    %c2_36 = arith.constant 2 : index
    %c0_37 = arith.constant 0 : index
    %c0_38 = arith.constant 0 : index
    %34 = vector.load %arg0[%c2_36, %c0_37, %c0_38] : memref<4x16x96xbf16, #tpu.memory_space<vmem>>, vector<1x14x96xbf16>
    %35 = vector.shape_cast %34 : vector<1x14x96xbf16> to vector<14x96xbf16>
    %c1_39 = arith.constant 1 : index
    %c0_40 = arith.constant 0 : index
    %c0_41 = arith.constant 0 : index
    %36 = vector.load %arg1[%c1_39, %c0_40, %c0_41] : memref<5x96x256xbf16, #tpu.memory_space<vmem>>, vector<1x96x256xbf16>
    %37 = vector.shape_cast %36 : vector<1x96x256xbf16> to vector<96x256xbf16>
    %cst_42 = arith.constant dense<0.000000e+00> : vector<14x256xf32>
    %38 = tpu.matmul %35, %37, %cst_42 {dimension_numbers = #tpu.dot_dimension_numbers<[1], [0], [0], [1], [0, 0, 1, 1], [], []>} : vector<14x96xbf16>, vector<96x256xbf16>, vector<14x256xf32> -> vector<14x256xf32>
    %39 = arith.addf %33, %38 : vector<14x256xf32>
    %c3_43 = arith.constant 3 : index
    %c0_44 = arith.constant 0 : index
    %c0_45 = arith.constant 0 : index
    %40 = vector.load %arg0[%c3_43, %c0_44, %c0_45] : memref<4x16x96xbf16, #tpu.memory_space<vmem>>, vector<1x14x96xbf16>
    %41 = vector.shape_cast %40 : vector<1x14x96xbf16> to vector<14x96xbf16>
    %c2_46 = arith.constant 2 : index
    %c0_47 = arith.constant 0 : index
    %c0_48 = arith.constant 0 : index
    %42 = vector.load %arg1[%c2_46, %c0_47, %c0_48] : memref<5x96x256xbf16, #tpu.memory_space<vmem>>, vector<1x96x256xbf16>
    %43 = vector.shape_cast %42 : vector<1x96x256xbf16> to vector<96x256xbf16>
    %cst_49 = arith.constant dense<0.000000e+00> : vector<14x256xf32>
    %44 = tpu.matmul %41, %43, %cst_49 {dimension_numbers = #tpu.dot_dimension_numbers<[1], [0], [0], [1], [0, 0, 1, 1], [], []>} : vector<14x96xbf16>, vector<96x256xbf16>, vector<14x256xf32> -> vector<14x256xf32>
    %45 = arith.addf %39, %44 : vector<14x256xf32>
    %c0_50 = arith.constant 0 : index
    %c2_51 = arith.constant 2 : index
    %c0_52 = arith.constant 0 : index
    %46 = vector.load %arg0[%c0_50, %c2_51, %c0_52] : memref<4x16x96xbf16, #tpu.memory_space<vmem>>, vector<1x14x96xbf16>
    %47 = vector.shape_cast %46 : vector<1x14x96xbf16> to vector<14x96xbf16>
    %c3_53 = arith.constant 3 : index
    %c0_54 = arith.constant 0 : index
    %c0_55 = arith.constant 0 : index
    %48 = vector.load %arg1[%c3_53, %c0_54, %c0_55] : memref<5x96x256xbf16, #tpu.memory_space<vmem>>, vector<1x96x256xbf16>
    %49 = vector.shape_cast %48 : vector<1x96x256xbf16> to vector<96x256xbf16>
    %cst_56 = arith.constant dense<0.000000e+00> : vector<14x256xf32>
    %50 = tpu.matmul %47, %49, %cst_56 {dimension_numbers = #tpu.dot_dimension_numbers<[1], [0], [0], [1], [0, 0, 1, 1], [], []>} : vector<14x96xbf16>, vector<96x256xbf16>, vector<14x256xf32> -> vector<14x256xf32>
    %51 = arith.addf %45, %50 : vector<14x256xf32>
    %c1_57 = arith.constant 1 : index
    %c2_58 = arith.constant 2 : index
    %c0_59 = arith.constant 0 : index
    %52 = vector.load %arg0[%c1_57, %c2_58, %c0_59] : memref<4x16x96xbf16, #tpu.memory_space<vmem>>, vector<1x14x96xbf16>
    %53 = vector.shape_cast %52 : vector<1x14x96xbf16> to vector<14x96xbf16>
    %c4_60 = arith.constant 4 : index
    %c0_61 = arith.constant 0 : index
    %c0_62 = arith.constant 0 : index
    %54 = vector.load %arg1[%c4_60, %c0_61, %c0_62] : memref<5x96x256xbf16, #tpu.memory_space<vmem>>, vector<1x96x256xbf16>
    %55 = vector.shape_cast %54 : vector<1x96x256xbf16> to vector<96x256xbf16>
    %cst_63 = arith.constant dense<0.000000e+00> : vector<14x256xf32>
    %56 = tpu.matmul %53, %55, %cst_63 {dimension_numbers = #tpu.dot_dimension_numbers<[1], [0], [0], [1], [0, 0, 1, 1], [], []>} : vector<14x96xbf16>, vector<96x256xbf16>, vector<14x256xf32> -> vector<14x256xf32>
    %57 = arith.addf %51, %56 : vector<14x256xf32>
    %58 = arith.maximumf %28, %57 : vector<14x256xf32>
    %c0_64 = arith.constant 0 : index
    %c0_65 = arith.constant 0 : index
    %59 = vector.load %arg2[%c0_64, %c0_65] : memref<1x256xf32, #tpu.memory_space<vmem>>, vector<1x256xf32>
    %60 = vector.broadcast %59 : vector<1x256xf32> to vector<14x256xf32>
    %61 = arith.addf %58, %60 : vector<14x256xf32>
    %cst_66 = arith.constant 0.000000e+00 : f32
    %62 = vector.broadcast %cst_66 : f32 to vector<14x256xf32>
    %63 = arith.maximumf %61, %62 : vector<14x256xf32>
    %64 = vector.extract_strided_slice %63 {offsets = [0, 0], sizes = [14, 128], strides = [1, 1]} : vector<14x256xf32> to vector<14x128xf32>
    %65 = vector.extract_strided_slice %63 {offsets = [0, 128], sizes = [14, 128], strides = [1, 1]} : vector<14x256xf32> to vector<14x128xf32>
    %66 = arith.maximumf %64, %65 : vector<14x128xf32>
    %67 = arith.truncf %66 : vector<14x128xf32> to vector<14x128xbf16>
    %c2_67 = arith.constant 2 : index
    %c0_68 = arith.constant 0 : index
    %c0_69 = arith.constant 0 : index
    %68 = vector.load %arg0[%c2_67, %c0_68, %c0_69] : memref<4x16x96xbf16, #tpu.memory_space<vmem>>, vector<1x14x96xbf16>
    %69 = vector.shape_cast %68 : vector<1x14x96xbf16> to vector<14x96xbf16>
    %c0_70 = arith.constant 0 : index
    %c0_71 = arith.constant 0 : index
    %c0_72 = arith.constant 0 : index
    %70 = vector.load %arg1[%c0_70, %c0_71, %c0_72] : memref<5x96x256xbf16, #tpu.memory_space<vmem>>, vector<1x96x256xbf16>
    %71 = vector.shape_cast %70 : vector<1x96x256xbf16> to vector<96x256xbf16>
    %cst_73 = arith.constant dense<0.000000e+00> : vector<14x256xf32>
    %72 = tpu.matmul %69, %71, %cst_73 {dimension_numbers = #tpu.dot_dimension_numbers<[1], [0], [0], [1], [0, 0, 1, 1], [], []>} : vector<14x96xbf16>, vector<96x256xbf16>, vector<14x256xf32> -> vector<14x256xf32>
    %c3_74 = arith.constant 3 : index
    %c0_75 = arith.constant 0 : index
    %c0_76 = arith.constant 0 : index
    %73 = vector.load %arg0[%c3_74, %c0_75, %c0_76] : memref<4x16x96xbf16, #tpu.memory_space<vmem>>, vector<1x14x96xbf16>
    %74 = vector.shape_cast %73 : vector<1x14x96xbf16> to vector<14x96xbf16>
    %c1_77 = arith.constant 1 : index
    %c0_78 = arith.constant 0 : index
    %c0_79 = arith.constant 0 : index
    %75 = vector.load %arg1[%c1_77, %c0_78, %c0_79] : memref<5x96x256xbf16, #tpu.memory_space<vmem>>, vector<1x96x256xbf16>
    %76 = vector.shape_cast %75 : vector<1x96x256xbf16> to vector<96x256xbf16>
    %cst_80 = arith.constant dense<0.000000e+00> : vector<14x256xf32>
    %77 = tpu.matmul %74, %76, %cst_80 {dimension_numbers = #tpu.dot_dimension_numbers<[1], [0], [0], [1], [0, 0, 1, 1], [], []>} : vector<14x96xbf16>, vector<96x256xbf16>, vector<14x256xf32> -> vector<14x256xf32>
    %78 = arith.addf %72, %77 : vector<14x256xf32>
    %c0_81 = arith.constant 0 : index
    %c2_82 = arith.constant 2 : index
    %c0_83 = arith.constant 0 : index
    %79 = vector.load %arg0[%c0_81, %c2_82, %c0_83] : memref<4x16x96xbf16, #tpu.memory_space<vmem>>, vector<1x14x96xbf16>
    %80 = vector.shape_cast %79 : vector<1x14x96xbf16> to vector<14x96xbf16>
    %c2_84 = arith.constant 2 : index
    %c0_85 = arith.constant 0 : index
    %c0_86 = arith.constant 0 : index
    %81 = vector.load %arg1[%c2_84, %c0_85, %c0_86] : memref<5x96x256xbf16, #tpu.memory_space<vmem>>, vector<1x96x256xbf16>
    %82 = vector.shape_cast %81 : vector<1x96x256xbf16> to vector<96x256xbf16>
    %cst_87 = arith.constant dense<0.000000e+00> : vector<14x256xf32>
    %83 = tpu.matmul %80, %82, %cst_87 {dimension_numbers = #tpu.dot_dimension_numbers<[1], [0], [0], [1], [0, 0, 1, 1], [], []>} : vector<14x96xbf16>, vector<96x256xbf16>, vector<14x256xf32> -> vector<14x256xf32>
    %84 = arith.addf %78, %83 : vector<14x256xf32>
    %c1_88 = arith.constant 1 : index
    %c2_89 = arith.constant 2 : index
    %c0_90 = arith.constant 0 : index
    %85 = vector.load %arg0[%c1_88, %c2_89, %c0_90] : memref<4x16x96xbf16, #tpu.memory_space<vmem>>, vector<1x14x96xbf16>
    %86 = vector.shape_cast %85 : vector<1x14x96xbf16> to vector<14x96xbf16>
    %c3_91 = arith.constant 3 : index
    %c0_92 = arith.constant 0 : index
    %c0_93 = arith.constant 0 : index
    %87 = vector.load %arg1[%c3_91, %c0_92, %c0_93] : memref<5x96x256xbf16, #tpu.memory_space<vmem>>, vector<1x96x256xbf16>
    %88 = vector.shape_cast %87 : vector<1x96x256xbf16> to vector<96x256xbf16>
    %cst_94 = arith.constant dense<0.000000e+00> : vector<14x256xf32>
    %89 = tpu.matmul %86, %88, %cst_94 {dimension_numbers = #tpu.dot_dimension_numbers<[1], [0], [0], [1], [0, 0, 1, 1], [], []>} : vector<14x96xbf16>, vector<96x256xbf16>, vector<14x256xf32> -> vector<14x256xf32>
    %90 = arith.addf %84, %89 : vector<14x256xf32>
    %c2_95 = arith.constant 2 : index
    %c2_96 = arith.constant 2 : index
    %c0_97 = arith.constant 0 : index
    %91 = vector.load %arg0[%c2_95, %c2_96, %c0_97] : memref<4x16x96xbf16, #tpu.memory_space<vmem>>, vector<1x14x96xbf16>
    %92 = vector.shape_cast %91 : vector<1x14x96xbf16> to vector<14x96xbf16>
    %c4_98 = arith.constant 4 : index
    %c0_99 = arith.constant 0 : index
    %c0_100 = arith.constant 0 : index
    %93 = vector.load %arg1[%c4_98, %c0_99, %c0_100] : memref<5x96x256xbf16, #tpu.memory_space<vmem>>, vector<1x96x256xbf16>
    %94 = vector.shape_cast %93 : vector<1x96x256xbf16> to vector<96x256xbf16>
    %cst_101 = arith.constant dense<0.000000e+00> : vector<14x256xf32>
    %95 = tpu.matmul %92, %94, %cst_101 {dimension_numbers = #tpu.dot_dimension_numbers<[1], [0], [0], [1], [0, 0, 1, 1], [], []>} : vector<14x96xbf16>, vector<96x256xbf16>, vector<14x256xf32> -> vector<14x256xf32>
    %96 = arith.addf %90, %95 : vector<14x256xf32>
    %c3_102 = arith.constant 3 : index
    %c0_103 = arith.constant 0 : index
    %c0_104 = arith.constant 0 : index
    %97 = vector.load %arg0[%c3_102, %c0_103, %c0_104] : memref<4x16x96xbf16, #tpu.memory_space<vmem>>, vector<1x14x96xbf16>
    %98 = vector.shape_cast %97 : vector<1x14x96xbf16> to vector<14x96xbf16>
    %c0_105 = arith.constant 0 : index
    %c0_106 = arith.constant 0 : index
    %c0_107 = arith.constant 0 : index
    %99 = vector.load %arg1[%c0_105, %c0_106, %c0_107] : memref<5x96x256xbf16, #tpu.memory_space<vmem>>, vector<1x96x256xbf16>
    %100 = vector.shape_cast %99 : vector<1x96x256xbf16> to vector<96x256xbf16>
    %cst_108 = arith.constant dense<0.000000e+00> : vector<14x256xf32>
    %101 = tpu.matmul %98, %100, %cst_108 {dimension_numbers = #tpu.dot_dimension_numbers<[1], [0], [0], [1], [0, 0, 1, 1], [], []>} : vector<14x96xbf16>, vector<96x256xbf16>, vector<14x256xf32> -> vector<14x256xf32>
    %c0_109 = arith.constant 0 : index
    %c2_110 = arith.constant 2 : index
    %c0_111 = arith.constant 0 : index
    %102 = vector.load %arg0[%c0_109, %c2_110, %c0_111] : memref<4x16x96xbf16, #tpu.memory_space<vmem>>, vector<1x14x96xbf16>
    %103 = vector.shape_cast %102 : vector<1x14x96xbf16> to vector<14x96xbf16>
    %c1_112 = arith.constant 1 : index
    %c0_113 = arith.constant 0 : index
    %c0_114 = arith.constant 0 : index
    %104 = vector.load %arg1[%c1_112, %c0_113, %c0_114] : memref<5x96x256xbf16, #tpu.memory_space<vmem>>, vector<1x96x256xbf16>
    %105 = vector.shape_cast %104 : vector<1x96x256xbf16> to vector<96x256xbf16>
    %cst_115 = arith.constant dense<0.000000e+00> : vector<14x256xf32>
    %106 = tpu.matmul %103, %105, %cst_115 {dimension_numbers = #tpu.dot_dimension_numbers<[1], [0], [0], [1], [0, 0, 1, 1], [], []>} : vector<14x96xbf16>, vector<96x256xbf16>, vector<14x256xf32> -> vector<14x256xf32>
    %107 = arith.addf %101, %106 : vector<14x256xf32>
    %c1_116 = arith.constant 1 : index
    %c2_117 = arith.constant 2 : index
    %c0_118 = arith.constant 0 : index
    %108 = vector.load %arg0[%c1_116, %c2_117, %c0_118] : memref<4x16x96xbf16, #tpu.memory_space<vmem>>, vector<1x14x96xbf16>
    %109 = vector.shape_cast %108 : vector<1x14x96xbf16> to vector<14x96xbf16>
    %c2_119 = arith.constant 2 : index
    %c0_120 = arith.constant 0 : index
    %c0_121 = arith.constant 0 : index
    %110 = vector.load %arg1[%c2_119, %c0_120, %c0_121] : memref<5x96x256xbf16, #tpu.memory_space<vmem>>, vector<1x96x256xbf16>
    %111 = vector.shape_cast %110 : vector<1x96x256xbf16> to vector<96x256xbf16>
    %cst_122 = arith.constant dense<0.000000e+00> : vector<14x256xf32>
    %112 = tpu.matmul %109, %111, %cst_122 {dimension_numbers = #tpu.dot_dimension_numbers<[1], [0], [0], [1], [0, 0, 1, 1], [], []>} : vector<14x96xbf16>, vector<96x256xbf16>, vector<14x256xf32> -> vector<14x256xf32>
    %113 = arith.addf %107, %112 : vector<14x256xf32>
    %c2_123 = arith.constant 2 : index
    %c2_124 = arith.constant 2 : index
    %c0_125 = arith.constant 0 : index
    %114 = vector.load %arg0[%c2_123, %c2_124, %c0_125] : memref<4x16x96xbf16, #tpu.memory_space<vmem>>, vector<1x14x96xbf16>
    %115 = vector.shape_cast %114 : vector<1x14x96xbf16> to vector<14x96xbf16>
    %c3_126 = arith.constant 3 : index
    %c0_127 = arith.constant 0 : index
    %c0_128 = arith.constant 0 : index
    %116 = vector.load %arg1[%c3_126, %c0_127, %c0_128] : memref<5x96x256xbf16, #tpu.memory_space<vmem>>, vector<1x96x256xbf16>
    %117 = vector.shape_cast %116 : vector<1x96x256xbf16> to vector<96x256xbf16>
    %cst_129 = arith.constant dense<0.000000e+00> : vector<14x256xf32>
    %118 = tpu.matmul %115, %117, %cst_129 {dimension_numbers = #tpu.dot_dimension_numbers<[1], [0], [0], [1], [0, 0, 1, 1], [], []>} : vector<14x96xbf16>, vector<96x256xbf16>, vector<14x256xf32> -> vector<14x256xf32>
    %119 = arith.addf %113, %118 : vector<14x256xf32>
    %c3_130 = arith.constant 3 : index
    %c2_131 = arith.constant 2 : index
    %c0_132 = arith.constant 0 : index
    %120 = vector.load %arg0[%c3_130, %c2_131, %c0_132] : memref<4x16x96xbf16, #tpu.memory_space<vmem>>, vector<1x14x96xbf16>
    %121 = vector.shape_cast %120 : vector<1x14x96xbf16> to vector<14x96xbf16>
    %c4_133 = arith.constant 4 : index
    %c0_134 = arith.constant 0 : index
    %c0_135 = arith.constant 0 : index
    %122 = vector.load %arg1[%c4_133, %c0_134, %c0_135] : memref<5x96x256xbf16, #tpu.memory_space<vmem>>, vector<1x96x256xbf16>
    %123 = vector.shape_cast %122 : vector<1x96x256xbf16> to vector<96x256xbf16>
    %cst_136 = arith.constant dense<0.000000e+00> : vector<14x256xf32>
    %124 = tpu.matmul %121, %123, %cst_136 {dimension_numbers = #tpu.dot_dimension_numbers<[1], [0], [0], [1], [0, 0, 1, 1], [], []>} : vector<14x96xbf16>, vector<96x256xbf16>, vector<14x256xf32> -> vector<14x256xf32>
    %125 = arith.addf %119, %124 : vector<14x256xf32>
    %126 = arith.maximumf %96, %125 : vector<14x256xf32>
    %c0_137 = arith.constant 0 : index
    %c0_138 = arith.constant 0 : index
    %127 = vector.load %arg2[%c0_137, %c0_138] : memref<1x256xf32, #tpu.memory_space<vmem>>, vector<1x256xf32>
    %128 = vector.broadcast %127 : vector<1x256xf32> to vector<14x256xf32>
    %129 = arith.addf %126, %128 : vector<14x256xf32>
    %cst_139 = arith.constant 0.000000e+00 : f32
    %130 = vector.broadcast %cst_139 : f32 to vector<14x256xf32>
    %131 = arith.maximumf %129, %130 : vector<14x256xf32>
    %132 = vector.extract_strided_slice %131 {offsets = [0, 0], sizes = [14, 128], strides = [1, 1]} : vector<14x256xf32> to vector<14x128xf32>
    %133 = vector.extract_strided_slice %131 {offsets = [0, 128], sizes = [14, 128], strides = [1, 1]} : vector<14x256xf32> to vector<14x128xf32>
    %134 = arith.maximumf %132, %133 : vector<14x128xf32>
    %135 = arith.truncf %134 : vector<14x128xf32> to vector<14x128xbf16>
    %136 = vector.extract_strided_slice %67 {offsets = [0, 0], sizes = [10, 128], strides = [1, 1]} : vector<14x128xbf16> to vector<10x128xbf16>
    %c0_140 = arith.constant 0 : index
    %c0_141 = arith.constant 0 : index
    %c0_142 = arith.constant 0 : index
    %137 = vector.load %arg3[%c0_140, %c0_141, %c0_142] : memref<5x128x256xbf16, #tpu.memory_space<vmem>>, vector<1x128x256xbf16>
    %138 = vector.shape_cast %137 : vector<1x128x256xbf16> to vector<128x256xbf16>
    %cst_143 = arith.constant dense<0.000000e+00> : vector<10x256xf32>
    %139 = tpu.matmul %136, %138, %cst_143 {dimension_numbers = #tpu.dot_dimension_numbers<[1], [0], [0], [1], [0, 0, 1, 1], [], []>} : vector<10x128xbf16>, vector<128x256xbf16>, vector<10x256xf32> -> vector<10x256xf32>
    %140 = vector.extract_strided_slice %135 {offsets = [0, 0], sizes = [10, 128], strides = [1, 1]} : vector<14x128xbf16> to vector<10x128xbf16>
    %c1_144 = arith.constant 1 : index
    %c0_145 = arith.constant 0 : index
    %c0_146 = arith.constant 0 : index
    %141 = vector.load %arg3[%c1_144, %c0_145, %c0_146] : memref<5x128x256xbf16, #tpu.memory_space<vmem>>, vector<1x128x256xbf16>
    %142 = vector.shape_cast %141 : vector<1x128x256xbf16> to vector<128x256xbf16>
    %cst_147 = arith.constant dense<0.000000e+00> : vector<10x256xf32>
    %143 = tpu.matmul %140, %142, %cst_147 {dimension_numbers = #tpu.dot_dimension_numbers<[1], [0], [0], [1], [0, 0, 1, 1], [], []>} : vector<10x128xbf16>, vector<128x256xbf16>, vector<10x256xf32> -> vector<10x256xf32>
    %144 = arith.addf %139, %143 : vector<10x256xf32>
    %145 = vector.extract_strided_slice %67 {offsets = [2, 0], sizes = [10, 128], strides = [1, 1]} : vector<14x128xbf16> to vector<10x128xbf16>
    %c2_148 = arith.constant 2 : index
    %c0_149 = arith.constant 0 : index
    %c0_150 = arith.constant 0 : index
    %146 = vector.load %arg3[%c2_148, %c0_149, %c0_150] : memref<5x128x256xbf16, #tpu.memory_space<vmem>>, vector<1x128x256xbf16>
    %147 = vector.shape_cast %146 : vector<1x128x256xbf16> to vector<128x256xbf16>
    %cst_151 = arith.constant dense<0.000000e+00> : vector<10x256xf32>
    %148 = tpu.matmul %145, %147, %cst_151 {dimension_numbers = #tpu.dot_dimension_numbers<[1], [0], [0], [1], [0, 0, 1, 1], [], []>} : vector<10x128xbf16>, vector<128x256xbf16>, vector<10x256xf32> -> vector<10x256xf32>
    %149 = arith.addf %144, %148 : vector<10x256xf32>
    %150 = vector.extract_strided_slice %135 {offsets = [2, 0], sizes = [10, 128], strides = [1, 1]} : vector<14x128xbf16> to vector<10x128xbf16>
    %c3_152 = arith.constant 3 : index
    %c0_153 = arith.constant 0 : index
    %c0_154 = arith.constant 0 : index
    %151 = vector.load %arg3[%c3_152, %c0_153, %c0_154] : memref<5x128x256xbf16, #tpu.memory_space<vmem>>, vector<1x128x256xbf16>
    %152 = vector.shape_cast %151 : vector<1x128x256xbf16> to vector<128x256xbf16>
    %cst_155 = arith.constant dense<0.000000e+00> : vector<10x256xf32>
    %153 = tpu.matmul %150, %152, %cst_155 {dimension_numbers = #tpu.dot_dimension_numbers<[1], [0], [0], [1], [0, 0, 1, 1], [], []>} : vector<10x128xbf16>, vector<128x256xbf16>, vector<10x256xf32> -> vector<10x256xf32>
    %154 = arith.addf %149, %153 : vector<10x256xf32>
    %155 = vector.extract_strided_slice %67 {offsets = [4, 0], sizes = [10, 128], strides = [1, 1]} : vector<14x128xbf16> to vector<10x128xbf16>
    %c4_156 = arith.constant 4 : index
    %c0_157 = arith.constant 0 : index
    %c0_158 = arith.constant 0 : index
    %156 = vector.load %arg3[%c4_156, %c0_157, %c0_158] : memref<5x128x256xbf16, #tpu.memory_space<vmem>>, vector<1x128x256xbf16>
    %157 = vector.shape_cast %156 : vector<1x128x256xbf16> to vector<128x256xbf16>
    %cst_159 = arith.constant dense<0.000000e+00> : vector<10x256xf32>
    %158 = tpu.matmul %155, %157, %cst_159 {dimension_numbers = #tpu.dot_dimension_numbers<[1], [0], [0], [1], [0, 0, 1, 1], [], []>} : vector<10x128xbf16>, vector<128x256xbf16>, vector<10x256xf32> -> vector<10x256xf32>
    %159 = arith.addf %154, %158 : vector<10x256xf32>
    %160 = vector.extract_strided_slice %135 {offsets = [0, 0], sizes = [10, 128], strides = [1, 1]} : vector<14x128xbf16> to vector<10x128xbf16>
    %c0_160 = arith.constant 0 : index
    %c0_161 = arith.constant 0 : index
    %c0_162 = arith.constant 0 : index
    %161 = vector.load %arg3[%c0_160, %c0_161, %c0_162] : memref<5x128x256xbf16, #tpu.memory_space<vmem>>, vector<1x128x256xbf16>
    %162 = vector.shape_cast %161 : vector<1x128x256xbf16> to vector<128x256xbf16>
    %cst_163 = arith.constant dense<0.000000e+00> : vector<10x256xf32>
    %163 = tpu.matmul %160, %162, %cst_163 {dimension_numbers = #tpu.dot_dimension_numbers<[1], [0], [0], [1], [0, 0, 1, 1], [], []>} : vector<10x128xbf16>, vector<128x256xbf16>, vector<10x256xf32> -> vector<10x256xf32>
    %164 = vector.extract_strided_slice %67 {offsets = [2, 0], sizes = [10, 128], strides = [1, 1]} : vector<14x128xbf16> to vector<10x128xbf16>
    %c1_164 = arith.constant 1 : index
    %c0_165 = arith.constant 0 : index
    %c0_166 = arith.constant 0 : index
    %165 = vector.load %arg3[%c1_164, %c0_165, %c0_166] : memref<5x128x256xbf16, #tpu.memory_space<vmem>>, vector<1x128x256xbf16>
    %166 = vector.shape_cast %165 : vector<1x128x256xbf16> to vector<128x256xbf16>
    %cst_167 = arith.constant dense<0.000000e+00> : vector<10x256xf32>
    %167 = tpu.matmul %164, %166, %cst_167 {dimension_numbers = #tpu.dot_dimension_numbers<[1], [0], [0], [1], [0, 0, 1, 1], [], []>} : vector<10x128xbf16>, vector<128x256xbf16>, vector<10x256xf32> -> vector<10x256xf32>
    %168 = arith.addf %163, %167 : vector<10x256xf32>
    %169 = vector.extract_strided_slice %135 {offsets = [2, 0], sizes = [10, 128], strides = [1, 1]} : vector<14x128xbf16> to vector<10x128xbf16>
    %c2_168 = arith.constant 2 : index
    %c0_169 = arith.constant 0 : index
    %c0_170 = arith.constant 0 : index
    %170 = vector.load %arg3[%c2_168, %c0_169, %c0_170] : memref<5x128x256xbf16, #tpu.memory_space<vmem>>, vector<1x128x256xbf16>
    %171 = vector.shape_cast %170 : vector<1x128x256xbf16> to vector<128x256xbf16>
    %cst_171 = arith.constant dense<0.000000e+00> : vector<10x256xf32>
    %172 = tpu.matmul %169, %171, %cst_171 {dimension_numbers = #tpu.dot_dimension_numbers<[1], [0], [0], [1], [0, 0, 1, 1], [], []>} : vector<10x128xbf16>, vector<128x256xbf16>, vector<10x256xf32> -> vector<10x256xf32>
    %173 = arith.addf %168, %172 : vector<10x256xf32>
    %174 = vector.extract_strided_slice %67 {offsets = [4, 0], sizes = [10, 128], strides = [1, 1]} : vector<14x128xbf16> to vector<10x128xbf16>
    %c3_172 = arith.constant 3 : index
    %c0_173 = arith.constant 0 : index
    %c0_174 = arith.constant 0 : index
    %175 = vector.load %arg3[%c3_172, %c0_173, %c0_174] : memref<5x128x256xbf16, #tpu.memory_space<vmem>>, vector<1x128x256xbf16>
    %176 = vector.shape_cast %175 : vector<1x128x256xbf16> to vector<128x256xbf16>
    %cst_175 = arith.constant dense<0.000000e+00> : vector<10x256xf32>
    %177 = tpu.matmul %174, %176, %cst_175 {dimension_numbers = #tpu.dot_dimension_numbers<[1], [0], [0], [1], [0, 0, 1, 1], [], []>} : vector<10x128xbf16>, vector<128x256xbf16>, vector<10x256xf32> -> vector<10x256xf32>
    %178 = arith.addf %173, %177 : vector<10x256xf32>
    %179 = vector.extract_strided_slice %135 {offsets = [4, 0], sizes = [10, 128], strides = [1, 1]} : vector<14x128xbf16> to vector<10x128xbf16>
    %c4_176 = arith.constant 4 : index
    %c0_177 = arith.constant 0 : index
    %c0_178 = arith.constant 0 : index
    %180 = vector.load %arg3[%c4_176, %c0_177, %c0_178] : memref<5x128x256xbf16, #tpu.memory_space<vmem>>, vector<1x128x256xbf16>
    %181 = vector.shape_cast %180 : vector<1x128x256xbf16> to vector<128x256xbf16>
    %cst_179 = arith.constant dense<0.000000e+00> : vector<10x256xf32>
    %182 = tpu.matmul %179, %181, %cst_179 {dimension_numbers = #tpu.dot_dimension_numbers<[1], [0], [0], [1], [0, 0, 1, 1], [], []>} : vector<10x128xbf16>, vector<128x256xbf16>, vector<10x256xf32> -> vector<10x256xf32>
    %183 = arith.addf %178, %182 : vector<10x256xf32>
    %184 = arith.maximumf %159, %183 : vector<10x256xf32>
    %c0_180 = arith.constant 0 : index
    %c0_181 = arith.constant 0 : index
    %185 = vector.load %arg4[%c0_180, %c0_181] : memref<1x256xf32, #tpu.memory_space<vmem>>, vector<1x256xf32>
    %186 = vector.broadcast %185 : vector<1x256xf32> to vector<10x256xf32>
    %187 = arith.addf %184, %186 : vector<10x256xf32>
    %cst_182 = arith.constant 0.000000e+00 : f32
    %188 = vector.broadcast %cst_182 : f32 to vector<10x256xf32>
    %189 = arith.maximumf %187, %188 : vector<10x256xf32>
    %190 = vector.extract_strided_slice %189 {offsets = [0, 0], sizes = [10, 128], strides = [1, 1]} : vector<10x256xf32> to vector<10x128xf32>
    %191 = vector.extract_strided_slice %189 {offsets = [0, 128], sizes = [10, 128], strides = [1, 1]} : vector<10x256xf32> to vector<10x128xf32>
    %192 = arith.maximumf %190, %191 : vector<10x128xf32>
    %193 = arith.truncf %192 : vector<10x128xf32> to vector<10x128xbf16>
    %194 = vector.extract_strided_slice %193 {offsets = [0, 0], sizes = [2, 128], strides = [1, 1]} : vector<10x128xbf16> to vector<2x128xbf16>
    %c0_183 = arith.constant 0 : index
    %c0_184 = arith.constant 0 : index
    %c0_185 = arith.constant 0 : index
    %195 = vector.load %arg5[%c0_183, %c0_184, %c0_185] : memref<5x128x120xbf16, #tpu.memory_space<vmem>>, vector<1x128x120xbf16>
    %196 = vector.shape_cast %195 : vector<1x128x120xbf16> to vector<128x120xbf16>
    %cst_186 = arith.constant dense<0.000000e+00> : vector<2x120xf32>
    %197 = tpu.matmul %194, %196, %cst_186 {dimension_numbers = #tpu.dot_dimension_numbers<[1], [0], [0], [1], [0, 0, 1, 1], [], []>} : vector<2x128xbf16>, vector<128x120xbf16>, vector<2x120xf32> -> vector<2x120xf32>
    %198 = vector.extract_strided_slice %193 {offsets = [2, 0], sizes = [2, 128], strides = [1, 1]} : vector<10x128xbf16> to vector<2x128xbf16>
    %c1_187 = arith.constant 1 : index
    %c0_188 = arith.constant 0 : index
    %c0_189 = arith.constant 0 : index
    %199 = vector.load %arg5[%c1_187, %c0_188, %c0_189] : memref<5x128x120xbf16, #tpu.memory_space<vmem>>, vector<1x128x120xbf16>
    %200 = vector.shape_cast %199 : vector<1x128x120xbf16> to vector<128x120xbf16>
    %cst_190 = arith.constant dense<0.000000e+00> : vector<2x120xf32>
    %201 = tpu.matmul %198, %200, %cst_190 {dimension_numbers = #tpu.dot_dimension_numbers<[1], [0], [0], [1], [0, 0, 1, 1], [], []>} : vector<2x128xbf16>, vector<128x120xbf16>, vector<2x120xf32> -> vector<2x120xf32>
    %202 = arith.addf %197, %201 : vector<2x120xf32>
    %203 = vector.extract_strided_slice %193 {offsets = [4, 0], sizes = [2, 128], strides = [1, 1]} : vector<10x128xbf16> to vector<2x128xbf16>
    %c2_191 = arith.constant 2 : index
    %c0_192 = arith.constant 0 : index
    %c0_193 = arith.constant 0 : index
    %204 = vector.load %arg5[%c2_191, %c0_192, %c0_193] : memref<5x128x120xbf16, #tpu.memory_space<vmem>>, vector<1x128x120xbf16>
    %205 = vector.shape_cast %204 : vector<1x128x120xbf16> to vector<128x120xbf16>
    %cst_194 = arith.constant dense<0.000000e+00> : vector<2x120xf32>
    %206 = tpu.matmul %203, %205, %cst_194 {dimension_numbers = #tpu.dot_dimension_numbers<[1], [0], [0], [1], [0, 0, 1, 1], [], []>} : vector<2x128xbf16>, vector<128x120xbf16>, vector<2x120xf32> -> vector<2x120xf32>
    %207 = arith.addf %202, %206 : vector<2x120xf32>
    %208 = vector.extract_strided_slice %193 {offsets = [6, 0], sizes = [2, 128], strides = [1, 1]} : vector<10x128xbf16> to vector<2x128xbf16>
    %c3_195 = arith.constant 3 : index
    %c0_196 = arith.constant 0 : index
    %c0_197 = arith.constant 0 : index
    %209 = vector.load %arg5[%c3_195, %c0_196, %c0_197] : memref<5x128x120xbf16, #tpu.memory_space<vmem>>, vector<1x128x120xbf16>
    %210 = vector.shape_cast %209 : vector<1x128x120xbf16> to vector<128x120xbf16>
    %cst_198 = arith.constant dense<0.000000e+00> : vector<2x120xf32>
    %211 = tpu.matmul %208, %210, %cst_198 {dimension_numbers = #tpu.dot_dimension_numbers<[1], [0], [0], [1], [0, 0, 1, 1], [], []>} : vector<2x128xbf16>, vector<128x120xbf16>, vector<2x120xf32> -> vector<2x120xf32>
    %212 = arith.addf %207, %211 : vector<2x120xf32>
    %213 = vector.extract_strided_slice %193 {offsets = [8, 0], sizes = [2, 128], strides = [1, 1]} : vector<10x128xbf16> to vector<2x128xbf16>
    %c4_199 = arith.constant 4 : index
    %c0_200 = arith.constant 0 : index
    %c0_201 = arith.constant 0 : index
    %214 = vector.load %arg5[%c4_199, %c0_200, %c0_201] : memref<5x128x120xbf16, #tpu.memory_space<vmem>>, vector<1x128x120xbf16>
    %215 = vector.shape_cast %214 : vector<1x128x120xbf16> to vector<128x120xbf16>
    %cst_202 = arith.constant dense<0.000000e+00> : vector<2x120xf32>
    %216 = tpu.matmul %213, %215, %cst_202 {dimension_numbers = #tpu.dot_dimension_numbers<[1], [0], [0], [1], [0, 0, 1, 1], [], []>} : vector<2x128xbf16>, vector<128x120xbf16>, vector<2x120xf32> -> vector<2x120xf32>
    %217 = arith.addf %212, %216 : vector<2x120xf32>
    %c0_203 = arith.constant 0 : index
    %c0_204 = arith.constant 0 : index
    %218 = vector.load %arg6[%c0_203, %c0_204] : memref<1x120xf32, #tpu.memory_space<vmem>>, vector<1x120xf32>
    %219 = vector.broadcast %218 : vector<1x120xf32> to vector<2x120xf32>
    %220 = arith.addf %217, %219 : vector<2x120xf32>
    %cst_205 = arith.constant 0.000000e+00 : f32
    %221 = vector.broadcast %cst_205 : f32 to vector<2x120xf32>
    %222 = arith.maximumf %220, %221 : vector<2x120xf32>
    %223 = arith.truncf %222 : vector<2x120xf32> to vector<2x120xbf16>
    %c0_206 = arith.constant 0 : index
    %c0_207 = arith.constant 0 : index
    %224 = vector.load %arg7[%c0_206, %c0_207] : memref<120x10xbf16, #tpu.memory_space<vmem>>, vector<120x10xbf16>
    %cst_208 = arith.constant dense<0.000000e+00> : vector<2x10xf32>
    %225 = tpu.matmul %223, %224, %cst_208 {dimension_numbers = #tpu.dot_dimension_numbers<[1], [0], [0], [1], [0, 0, 1, 1], [], []>} : vector<2x120xbf16>, vector<120x10xbf16>, vector<2x10xf32> -> vector<2x10xf32>
    %c0_209 = arith.constant 0 : index
    %c0_210 = arith.constant 0 : index
    %226 = vector.load %arg8[%c0_209, %c0_210] : memref<1x10xf32, #tpu.memory_space<vmem>>, vector<1x10xf32>
    %227 = vector.broadcast %226 : vector<1x10xf32> to vector<2x10xf32>
    %228 = arith.addf %225, %227 : vector<2x10xf32>
    %c0_211 = arith.constant 0 : index
    %c0_212 = arith.constant 0 : index
    %229 = vector.load %arg9[%c0_211, %c0_212] : memref<2x10xf32, #tpu.memory_space<vmem>>, vector<2x10xf32>
    tpu.vector_store %arg9[%c0_211, %c0_212], %228 {strides = array<i32>} : memref<2x10xf32, #tpu.memory_space<vmem>>, vector<2x10xf32>,
    return
  }
}

</mosaic_0001>

<bundles_post_ra>
// kernel: net_forward.1
= control target key start
LH: loop header
LB: loop body
LE: loop exit
PB: predicated region body
PF: predicated region fallthrough
CT: control target
= control target key end

     0   :  { %v5448_v2 = vmov 0   ;;  %vm129_vm0 = vcmask 785408   ;;  %s5438_s0 = inlined_call_operand.vmem [shape: bf16[4,16,96], index: 0, kind: input, shape index: {}]   ;;  %s5439_s1 = inlined_call_operand.vmem [shape: bf16[5,96,256], index: 1, kind: input, shape index: {}]   ;;  %s5440_s2 = inlined_call_operand.vmem [shape: f32[1,256], index: 2, kind: input, shape index: {}]   ;;  %s5441_s3 = inlined_call_operand.vmem [shape: bf16[5,128,256], index: 3, kind: input, shape index: {}]   ;;  %s5442_s4 = inlined_call_operand.vmem [shape: f32[1,256], index: 4, kind: input, shape index: {}]   ;;  %s5443_s5 = inlined_call_operand.vmem [shape: bf16[5,128,120], index: 5, kind: input, shape index: {}]   ;;  %s5444_s6 = inlined_call_operand.vmem [shape: f32[1,120], index: 6, kind: input, shape index: {}]   ;;  %s5445_s7 = inlined_call_operand.vmem [shape: bf16[120,10], index: 7, kind: input, shape index: {}]   ;;  %s5446_s8 = inlined_call_operand.vmem [shape: f32[1,10], index: 8, kind: input, shape index: {}]   ;;  %s5447_s9 = inlined_call_operand.hbm [shape: f32[2,10], index: 9, kind: output, shape index: {}]  }
   0x1   :  { %v4028_v0 = vld [vmem:[%s5439_s1 + $0xb4] ss:$8 sps:$4 sm:$0xff]   ;;  %165 = vmatprep.mubr.bf16.mxu0 %v5448_v2  ;;  %276 = vmatprep.mubr.bf16.mxu1 %v5448_v2  ;;  %v4041_v3 = vld [vmem:[%s5439_s1 + $0xb0] ss:$8 sps:$4 sm:$0xff]   ;;  %v4052_v5 = vld [vmem:[%s5439_s1 + $0xa4] ss:$8 sps:$4 sm:$0xff]  }
   0x2   :  { %v4033_v1 = vld [vmem:[%s5439_s1 + $0x54] ss:$8 sps:$4 sm:$0xff]   ;;  %137 = vmatprep.subr.bf16.mxu0 %v4028_v0  ;;  %v4046_v4 = vld [vmem:[%s5439_s1 + $0x50] ss:$8 sps:$4 sm:$0xff]   ;;  %v4059_v6 = vld [vmem:[%s5439_s1 + $0x44] ss:$8 sps:$4 sm:$0xff]  }
   0x3   :  { %248 = vmatprep.subr.bf16.mxu1 %v4033_v1  ;;  %138 = vmatpush1.bf16.msra.mxu0 %v4041_v3  ;;  %v4064_v7 = vld [vmem:[%s5439_s1 + $0xa0] ss:$8 sps:$4 sm:$0xff]   ;;  %v4076_v9 = vld [vmem:[%s5439_s1 + $0x94] ss:$8 sps:$4 sm:$0xff]   ;;  %v4086_v11 = vld [vmem:[%s5439_s1 + $0x90] ss:$8 sps:$4 sm:$0xff]  }
   0x4   :  { %249 = vmatpush1.bf16.msra.mxu1 %v4046_v4  ;;  %139 = vmatprep.subr.bf16.mxu0 %v4052_v5  ;;  %v4070_v8 = vld [vmem:[%s5439_s1 + $0x40] ss:$8 sps:$4 sm:$0xff]   ;;  %v4081_v10 = vld [vmem:[%s5439_s1 + $0x34] ss:$8 sps:$4 sm:$0xff]   ;;  %v4091_v12 = vld [vmem:[%s5439_s1 + $0x30] ss:$8 sps:$4 sm:$0xff]  }
   0x5   :  { %250 = vmatprep.subr.bf16.mxu1 %v4059_v6  ;;  %v4098_v13 = vld [vmem:[%s5439_s1 + $0x84] ss:$8 sps:$4 sm:$0xff]   ;;  %v4110_v15 = vld [vmem:[%s5439_s1 + $0x80] ss:$8 sps:$4 sm:$0xff]   ;;  %v4122_v17 = vld [vmem:[%s5439_s1 + $0x74] ss:$8 sps:$4 sm:$0xff]  }
   0x6   :  { %v4105_v14 = vld [vmem:[%s5439_s1 + $0x24] ss:$8 sps:$4 sm:$0xff]   ;;  %5497 = vst [vmem:[#allocation5_spill] sm:$0xff] %v4110_v15  ;;  %v4117_v16 = vld [vmem:[%s5439_s1 + $0x20] ss:$8 sps:$4 sm:$0xff]  }
   0x7   :  { %140 = vmatpush1.bf16.msra.mxu0 %v4064_v7  ;;  %v4129_v18 = vld [vmem:[%s5439_s1 + $0x14] ss:$8 sps:$4 sm:$0xff]   ;;  %v4134_v19 = vld [vmem:[%s5439_s1 + $0x70] ss:$8 sps:$4 sm:$0xff]   ;;  %v4146_v21 = vld [vmem:[%s5439_s1 + $0x64] ss:$8 sps:$4 sm:$0xff]  }
   0x8   :  { %251 = vmatpush1.bf16.msra.mxu1 %v4070_v8  ;;  %141 = vmatprep.subr.bf16.mxu0 %v4076_v9  ;;  %v4139_v20 = vld [vmem:[%s5439_s1 + $0x10] ss:$8 sps:$4 sm:$0xff]   ;;  %v4153_v22 = vld [vmem:[%s5439_s1 + $0x4] ss:$8 sps:$4 sm:$0xff]   ;;  %v4158_v23 = vld [vmem:[%s5439_s1 + $0x60] ss:$8 sps:$4 sm:$0xff]  }
   0x9   :  { %252 = vmatprep.subr.bf16.mxu1 %v4081_v10  ;;  %v4165_v24 = vld [vmem:[%s5439_s1] ss:$8 sps:$4 sm:$0xff]   ;;  %v4170_v25 = vld [vmem:[%s5439_s1 + $0x114] ss:$8 sps:$4 sm:$0xff]   ;;  %v4190_v29 = vld [vmem:[%s5439_s1 + $0x110] ss:$8 sps:$4 sm:$0xff]  }
   0xa   :  { %v4177_v26 = vld [vmem:[%s5439_s1 + $0x174] ss:$8 sps:$4 sm:$0xff]   ;;  %v4182_v27 = vld [vmem:[%s5438_s0 + $0x8] sm:$0x7f]   ;;  %v3710_v28 = vld [vmem:[%s5438_s0] sm:$0x7f]  }
   0xb   :  { %142 = vmatpush1.bf16.msra.mxu0 %v4086_v11  ;;  %v4197_v30 = vld [vmem:[%s5439_s1 + $0x170] ss:$8 sps:$4 sm:$0xff]   ;;  %v4204_v31 = vld [vmem:[%s5439_s1 + $0x104] ss:$8 sps:$4 sm:$0xff]   ;;  %v4217_v33 = vld [vmem:[%s5439_s1 + $0x100] ss:$8 sps:$4 sm:$0xff]  }
   0xc   :  { %253 = vmatpush1.bf16.msra.mxu1 %v4091_v12  ;;  %143 = vmatprep.subr.bf16.mxu0 %v4098_v13  ;;  %v4209_v32 = vld [vmem:[%s5439_s1 + $0x164] ss:$8 sps:$4 sm:$0xff]   ;;  %v4224_v34 = vld [vmem:[%s5439_s1 + $0x160] ss:$8 sps:$4 sm:$0xff]   ;;  %v4229_v35 = vld [vmem:[%s5439_s1 + $0xf4] ss:$8 sps:$4 sm:$0xff]  }
   0xd   :  { %254 = vmatprep.subr.bf16.mxu1 %v4105_v14  ;;  %v4236_v36 = vld [vmem:[%s5439_s1 + $0x154] ss:$8 sps:$4 sm:$0xff]   ;;  %v4243_v37 = vld [vmem:[%s5439_s1 + $0xf0] ss:$8 sps:$4 sm:$0xff]   ;;  %v4257_v39 = vld [vmem:[%s5439_s1 + $0xe4] ss:$8 sps:$4 sm:$0xff]  }
   0xe   :  { %v4250_v38 = vld [vmem:[%s5439_s1 + $0x150] ss:$8 sps:$4 sm:$0xff]   ;;  %v4262_v40 = vld [vmem:[%s5439_s1 + $0x144] ss:$8 sps:$4 sm:$0xff]   ;;  %v4267_v41 = vld [vmem:[%s5439_s1 + $0xe0] ss:$8 sps:$4 sm:$0xff]  }
   0xf   :  { %144 = vmatpush1.bf16.msra.mxu0 %v4110_v15  ;;  %v4272_v42 = vld [vmem:[%s5439_s1 + $0x140] ss:$8 sps:$4 sm:$0xff]   ;;  %v4279_v43 = vld [vmem:[%s5439_s1 + $0xd4] ss:$8 sps:$4 sm:$0xff]   ;;  %v4291_v45 = vld [vmem:[%s5439_s1 + $0xd0] ss:$8 sps:$4 sm:$0xff]  }
  0x10   :  { %255 = vmatpush1.bf16.msra.mxu1 %v4117_v16  ;;  %145 = vmatprep.subr.bf16.mxu0 %v4122_v17  ;;  %v4286_v44 = vld [vmem:[%s5439_s1 + $0x134] ss:$8 sps:$4 sm:$0xff]   ;;  %v4296_v46 = vld [vmem:[%s5439_s1 + $0x130] ss:$8 sps:$4 sm:$0xff]   ;;  %v4303_v47 = vld [vmem:[%s5439_s1 + $0xc4] ss:$8 sps:$4 sm:$0xff]  }
  0x11   :  { %256 = vmatprep.subr.bf16.mxu1 %v4129_v18  ;;  %v4310_v48 = vld [vmem:[%s5439_s1 + $0x124] ss:$8 sps:$4 sm:$0xff]   ;;  %v4315_v49 = vld [vmem:[%s5439_s1 + $0xc0] ss:$8 sps:$4 sm:$0xff]   ;;  %v4329_v51 = vld [vmem:[%s5438_s0 + $0x10] sm:$0x7f]  }
  0x12   :  { %v4322_v50 = vld [vmem:[%s5439_s1 + $0x120] ss:$8 sps:$4 sm:$0xff]   ;;  %v4334_v52 = vld [vmem:[%s5438_s0 + $0x18] sm:$0x7f]   ;;  %v4349_v55 = vld [vmem:[%s5439_s1 + $0x1c4] ss:$8 sps:$4 sm:$0xff]  }
  0x13   :  { %146 = vmatpush1.bf16.msra.mxu0 %v4134_v19  ;;  %v4339_v53 = vld [vmem:[%s5439_s1 + $0x1d4] ss:$8 sps:$4 sm:$0xff]   ;;  %v4344_v54 = vld [vmem:[%s5439_s1 + $0x1d0] ss:$8 sps:$4 sm:$0xff]   ;;  %v4358_v56 = vld [vmem:[%s5439_s1 + $0x1c0] ss:$8 sps:$4 sm:$0xff]  }
  0x14   :  { %257 = vmatpush1.bf16.msra.mxu1 %v4139_v20  ;;  %147 = vmatprep.subr.bf16.mxu0 %v4146_v21  ;;  %v4367_v57 = vld [vmem:[%s5439_s1 + $0x1b4] ss:$8 sps:$4 sm:$0xff]   ;;  %v4376_v58 = vld [vmem:[%s5439_s1 + $0x1b0] ss:$8 sps:$4 sm:$0xff]   ;;  %v4383_v59 = vld [vmem:[%s5439_s1 + $0x1a4] ss:$8 sps:$4 sm:$0xff]  }
  0x15   :  { %258 = vmatprep.subr.bf16.mxu1 %v4153_v22  ;;  %5498 = vst [vmem:[#allocation6_spill] sm:$0xff] %v4383_v59  ;;  %v4392_v60 = vld [vmem:[%s5439_s1 + $0x1a0] ss:$8 sps:$4 sm:$0xff]   ;;  %v4397_v61 = vld [vmem:[%s5439_s1 + $0x194] ss:$8 sps:$4 sm:$0xff]  }
  0x16   :  { %v4406_v62 = vld [vmem:[%s5439_s1 + $0x190] ss:$8 sps:$4 sm:$0xff]   ;;  %v4411_v63 = vld [vmem:[%s5439_s1 + $0x184] ss:$8 sps:$4 sm:$0xff]  }
  0x17   :  { %148 = vmatpush1.bf16.msra.mxu0 %v4158_v23 }
  0x18   :  { %259 = vmatpush1.bf16.msra.mxu1 %v4165_v24  ;;  %375 = vmatprep.subr.bf16.mxu0 %v4170_v25 }
  0x19   :  { %506 = vmatprep.subr.bf16.mxu1 %v4177_v26 }
  0x1a   :  { %3115 = vmatmul.mubr.msk.bf16.vlgmr.msra.gmra.mxu0 %vm129_vm0, %v4182_v27 }
  0x1b   :  { %3129 = vmatmul.mubr.msk.bf16.vlgmr.msra.gmra.mxu1 %vm129_vm0, %v3710_v28  ;;  %376 = vmatpush1.bf16.msra.mxu0 %v4190_v29  ;;  %v3767_v28 = vld [vmem:[%s5438_s0] sm:$0xfe]  }
  0x1c   :  { %507 = vmatpush1.bf16.msra.mxu1 %v4197_v30  ;;  %377 = vmatprep.subr.bf16.mxu0 %v4204_v31 }
  0x1d   :  { %508 = vmatprep.subr.bf16.mxu1 %v4209_v32  ;;  %403 = vmatprep.mubr.bf16.mxu0 %v5448_v2 }
  0x1e   :  { %534 = vmatprep.mubr.bf16.mxu1 %v5448_v2 }
  0x1f   :  { %378 = vmatpush1.bf16.msra.mxu0 %v4217_v33 }
  0x20   :  { %509 = vmatpush1.bf16.msra.mxu1 %v4224_v34  ;;  %379 = vmatprep.subr.bf16.mxu0 %v4229_v35 }
  0x21   :  { %510 = vmatprep.subr.bf16.mxu1 %v4236_v36 }
  0x23   :  { %380 = vmatpush1.bf16.msra.mxu0 %v4243_v37 }
  0x24   :  { %511 = vmatpush1.bf16.msra.mxu1 %v4250_v38  ;;  %381 = vmatprep.subr.bf16.mxu0 %v4257_v39 }
  0x25   :  { %512 = vmatprep.subr.bf16.mxu1 %v4262_v40 }
  0x27   :  { %382 = vmatpush1.bf16.msra.mxu0 %v4267_v41 }
  0x28   :  { %513 = vmatpush1.bf16.msra.mxu1 %v4272_v42  ;;  %383 = vmatprep.subr.bf16.mxu0 %v4279_v43 }
  0x29   :  { %514 = vmatprep.subr.bf16.mxu1 %v4286_v44 }
  0x2b   :  { %384 = vmatpush1.bf16.msra.mxu0 %v4291_v45 }
  0x2c   :  { %515 = vmatpush1.bf16.msra.mxu1 %v4296_v46  ;;  %385 = vmatprep.subr.bf16.mxu0 %v4303_v47 }
  0x2d   :  { %516 = vmatprep.subr.bf16.mxu1 %v4310_v48 }
  0x2f   :  { %386 = vmatpush1.bf16.msra.mxu0 %v4315_v49 }
  0x30   :  { %517 = vmatpush1.bf16.msra.mxu1 %v4322_v50  ;;  %637 = vmatprep.subr.bf16.mxu0 %v4339_v53 }
  0x31   :  { %684 = vmatprep.subr.bf16.mxu1 %v4028_v0 }
  0x32   :  { %3157 = vmatmul.mubr.msk.bf16.vlgmr.msra.gmra.mxu0 %vm129_vm0, %v4329_v51 }
  0x33   :  { %3185 = vmatmul.mubr.msk.bf16.vlgmr.msra.gmra.mxu1 %vm129_vm0, %v4334_v52  ;;  %638 = vmatpush1.bf16.msra.mxu0 %v4344_v54 }
  0x34   :  { %685 = vmatpush1.bf16.msra.mxu1 %v4041_v3  ;;  %639 = vmatprep.subr.bf16.mxu0 %v4349_v55 }
  0x35   :  { %686 = vmatprep.subr.bf16.mxu1 %v4052_v5  ;;  %665 = vmatprep.mubr.bf16.mxu0 %v5448_v2 }
  0x36   :  { %712 = vmatprep.mubr.bf16.mxu1 %v5448_v2  ;;  %v4423_v2 = vld [vmem:[%s5439_s1 + $0x180] ss:$8 sps:$4 sm:$0xff]  }
  0x37   :  { %640 = vmatpush1.bf16.msra.mxu0 %v4358_v56 }
  0x38   :  { %687 = vmatpush1.bf16.msra.mxu1 %v4064_v7  ;;  %641 = vmatprep.subr.bf16.mxu0 %v4367_v57 }
  0x39   :  { %688 = vmatprep.subr.bf16.mxu1 %v4076_v9 }
  0x3b   :  { %642 = vmatpush1.bf16.msra.mxu0 %v4376_v58 }
  0x3c   :  { %689 = vmatpush1.bf16.msra.mxu1 %v4086_v11  ;;  %643 = vmatprep.subr.bf16.mxu0 %v4383_v59 }
  0x3d   :  { %690 = vmatprep.subr.bf16.mxu1 %v4098_v13 }
  0x3f   :  { %644 = vmatpush1.bf16.msra.mxu0 %v4392_v60 }
  0x40   :  { %691 = vmatpush1.bf16.msra.mxu1 %v4110_v15  ;;  %645 = vmatprep.subr.bf16.mxu0 %v4397_v61  ;;  %v4429_v15 = vrot.slane %v3767_v28, 1  ;;  %v5499_v28 = vmov 0  }
  0x41   :  { %692 = vmatprep.subr.bf16.mxu1 %v4122_v17 }
  0x43   :  { %646 = vmatpush1.bf16.msra.mxu0 %v4406_v62 }
  0x44   :  { %693 = vmatpush1.bf16.msra.mxu1 %v4134_v19  ;;  %647 = vmatprep.subr.bf16.mxu0 %v4411_v63 }
  0x45   :  { %694 = vmatprep.subr.bf16.mxu1 %v4146_v21 }
  0x47   :  { %648 = vmatpush1.bf16.msra.mxu0 %v4423_v2 }
  0x48   :  { %695 = vmatpush1.bf16.msra.mxu1 %v4158_v23  ;;  %727 = vmatprep.subr.bf16.mxu0 %v4033_v1 }
  0x49   :  { %770 = vmatprep.subr.bf16.mxu1 %v4170_v25 }
  0x4a   :  { %3211 = vmatmul.mubr.msk.bf16.vlgmr.msra.gmra.mxu0 %vm129_vm0, %v4429_v15 }
  0x4b   :  { %3212 = vmatmul.mubr.msk.bf16.vlgmr.msra.gmra.mxu1 %vm129_vm0, %v4329_v51  ;;  %728 = vmatpush1.bf16.msra.mxu0 %v4046_v4 }
  0x4c   :  { %771 = vmatpush1.bf16.msra.mxu1 %v4190_v29  ;;  %729 = vmatprep.subr.bf16.mxu0 %v4059_v6 }
  0x4d   :  { %772 = vmatprep.subr.bf16.mxu1 %v4204_v31  ;;  %755 = vmatprep.mubr.bf16.mxu0 %v5499_v28 }
  0x4e   :  { %798 = vmatprep.mubr.bf16.mxu1 %v5499_v28 }
  0x4f   :  { %730 = vmatpush1.bf16.msra.mxu0 %v4070_v8 }
  0x50   :  { %773 = vmatpush1.bf16.msra.mxu1 %v4217_v33  ;;  %731 = vmatprep.subr.bf16.mxu0 %v4081_v10 }
  0x51   :  { %774 = vmatprep.subr.bf16.mxu1 %v4229_v35 }
  0x53   :  { %732 = vmatpush1.bf16.msra.mxu0 %v4091_v12 }
  0x54   :  { %775 = vmatpush1.bf16.msra.mxu1 %v4243_v37  ;;  %733 = vmatprep.subr.bf16.mxu0 %v4105_v14 }
  0x55   :  { %776 = vmatprep.subr.bf16.mxu1 %v4257_v39 }
  0x57   :  { %734 = vmatpush1.bf16.msra.mxu0 %v4117_v16 }
  0x58   :  { %777 = vmatpush1.bf16.msra.mxu1 %v4267_v41  ;;  %735 = vmatprep.subr.bf16.mxu0 %v4129_v18 }
  0x59   :  { %778 = vmatprep.subr.bf16.mxu1 %v4279_v43 }
  0x5b   :  { %736 = vmatpush1.bf16.msra.mxu0 %v4139_v20 }
  0x5c   :  { %779 = vmatpush1.bf16.msra.mxu1 %v4291_v45  ;;  %737 = vmatprep.subr.bf16.mxu0 %v4153_v22 }
  0x5d   :  { %780 = vmatprep.subr.bf16.mxu1 %v4303_v47 }
  0x5f   :  { %738 = vmatpush1.bf16.msra.mxu0 %v4165_v24 }
  0x60   :  { %781 = vmatpush1.bf16.msra.mxu1 %v4315_v49  ;;  %817 = vmatprep.subr.bf16.mxu0 %v4177_v26 }
  0x61   :  { %875 = vmatprep.subr.bf16.mxu1 %v4339_v53 }
  0x62   :  { %3213 = vmatmul.mubr.msk.bf16.vlgmr.msra.gmra.mxu0 %vm129_vm0, %v4182_v27 }
  0x63   :  { %3214 = vmatmul.mubr.msk.bf16.vlgmr.msra.gmra.mxu1 %vm129_vm0, %v4334_v52  ;;  %818 = vmatpush1.bf16.msra.mxu0 %v4197_v30 }
  0x64   :  { %876 = vmatpush1.bf16.msra.mxu1 %v4344_v54  ;;  %819 = vmatprep.subr.bf16.mxu0 %v4209_v32 }
  0x65   :  { %877 = vmatprep.subr.bf16.mxu1 %v4349_v55  ;;  %845 = vmatprep.mubr.bf16.mxu0 %v5499_v28 }
  0x66   :  { %903 = vmatprep.mubr.bf16.mxu1 %v5499_v28 }
  0x67   :  { %820 = vmatpush1.bf16.msra.mxu0 %v4224_v34 }
  0x68   :  { %878 = vmatpush1.bf16.msra.mxu1 %v4358_v56  ;;  %821 = vmatprep.subr.bf16.mxu0 %v4236_v36 }
  0x69   :  { %879 = vmatprep.subr.bf16.mxu1 %v4367_v57 }
  0x6a   :  { %14 = vsyncpa [#allocation3], 0  ;;  %v3768_v27 = vld [vmem:[%s5438_s0 + $0x8] sm:$0xfe]   ;;  %vm3973_vm1 = vmmov 0   ;;  %vm3028_vm2 = vcmask 1043456  }
  0x6b   :  { %822 = vmatpush1.bf16.msra.mxu0 %v4250_v38  ;;  %vm3024_vm3 = vcmask 982016   ;;  %s3974_s12 = smov [#allocation2]   ;;  %vm3072_vm4 = vcmask 74752  }
  0x6c   :  { %880 = vmatpush1.bf16.msra.mxu1 %v4376_v58  ;;  %823 = vmatprep.subr.bf16.mxu0 %v4262_v40 }
  0x6d   :  { %881 = vmatprep.subr.bf16.mxu1 %v4383_v59  ;;  %v4494_v59 = vrot.slane %v3768_v27, 1  ;;  %v4840_v27 = vld [vmem:[%s5441_s3 + $0xd0] ss:$8 sps:$4 sm:$0xff]  }
  0x6f   :  { %824 = vmatpush1.bf16.msra.mxu0 %v4272_v42 }
  0x70   :  { %882 = vmatpush1.bf16.msra.mxu1 %v4392_v60  ;;  %825 = vmatprep.subr.bf16.mxu0 %v4286_v44 }
  0x71   :  { %883 = vmatprep.subr.bf16.mxu1 %v4397_v61 }
  0x73   :  { %826 = vmatpush1.bf16.msra.mxu0 %v4296_v46 }
  0x74   :  { %884 = vmatpush1.bf16.msra.mxu1 %v4406_v62  ;;  %827 = vmatprep.subr.bf16.mxu0 %v4310_v48 }
  0x75   :  { %885 = vmatprep.subr.bf16.mxu1 %v4411_v63 }
  0x77   :  { %828 = vmatpush1.bf16.msra.mxu0 %v4322_v50 }
  0x78   :  { %886 = vmatpush1.bf16.msra.mxu1 %v4423_v2  ;;  %949 = vmatprep.subr.bf16.mxu0 %v4028_v0  ;;  %v5500_v0 = vld [vmem:[#allocation5_spill] sm:$0xff] }
  0x79   :  { %992 = vmatprep.subr.bf16.mxu1 %v4033_v1  ;;  %v3939_v1 = vld [vmem:[%s5439_s1 + $0xb4] ss:$8 sps:$4 sm:$0xff]  }
  0x7a   :  { %3215 = vmatmul.mubr.msk.bf16.vlgmr.msra.gmra.mxu0 %vm129_vm0, %v4429_v15 }
  0x7b   :  { %3219 = vmatmul.mubr.msk.bf16.vlgmr.msra.gmra.mxu1 %vm129_vm0, %v4494_v59  ;;  %950 = vmatpush1.bf16.msra.mxu0 %v4041_v3 }
  0x7c   :  { %993 = vmatpush1.bf16.msra.mxu1 %v4046_v4  ;;  %951 = vmatprep.subr.bf16.mxu0 %v4052_v5  ;;  %v4587_v4 = vld [vmem:[%s5438_s0 + $0x10] sm:$0xfe]  }
  0x7d   :  { %994 = vmatprep.subr.bf16.mxu1 %v4059_v6  ;;  %977 = vmatprep.mubr.bf16.mxu0 %v5499_v28  ;;  %v3940_v6 = vld [vmem:[%s5439_s1 + $0x54] ss:$8 sps:$4 sm:$0xff]  }
  0x7e   :  { %1020 = vmatprep.mubr.bf16.mxu1 %v5499_v28 }
  0x7f   :  { %952 = vmatpush1.bf16.msra.mxu0 %v4064_v7 }
  0x80   :  { %995 = vmatpush1.bf16.msra.mxu1 %v4070_v8  ;;  %953 = vmatprep.subr.bf16.mxu0 %v4076_v9  ;;  %v3942_v8 = vld [vmem:[%s5439_s1 + $0x44] ss:$8 sps:$4 sm:$0xff]  }
  0x81   :  { %996 = vmatprep.subr.bf16.mxu1 %v4081_v10  ;;  %v3944_v10 = vld [vmem:[%s5439_s1 + $0x34] ss:$8 sps:$4 sm:$0xff]  }
  0x83   :  { %954 = vmatpush1.bf16.msra.mxu0 %v4086_v11 }
  0x84   :  { %997 = vmatpush1.bf16.msra.mxu1 %v4091_v12  ;;  %955 = vmatprep.subr.bf16.mxu0 %v4098_v13  ;;  %v3946_v12 = vld [vmem:[%s5439_s1 + $0x24] ss:$8 sps:$4 sm:$0xff]  }
  0x85   :  { %998 = vmatprep.subr.bf16.mxu1 %v4105_v14  ;;  %v3948_v14 = vld [vmem:[%s5439_s1 + $0x14] ss:$8 sps:$4 sm:$0xff]  }
  0x87   :  { %956 = vmatpush1.bf16.msra.mxu0 %v5500_v0 }
  0x88   :  { %999 = vmatpush1.bf16.msra.mxu1 %v4117_v16  ;;  %957 = vmatprep.subr.bf16.mxu0 %v4122_v17  ;;  %v4679_v16 = vld [vmem:[%s5441_s3 + $0x74] ss:$8 sps:$4 sm:$0xff]  }
  0x89   :  { %1000 = vmatprep.subr.bf16.mxu1 %v4129_v18  ;;  %5502 = vst [vmem:[#allocation5_spill] sm:$0xff] %v4679_v16  ;;  %v4686_v18 = vld [vmem:[%s5441_s3 + $0x70] ss:$8 sps:$4 sm:$0xff]  }
  0x8b   :  { %958 = vmatpush1.bf16.msra.mxu0 %v4134_v19 }
  0x8c   :  { %1001 = vmatpush1.bf16.msra.mxu1 %v4139_v20  ;;  %959 = vmatprep.subr.bf16.mxu0 %v4146_v21 }
  0x8d   :  { %1002 = vmatprep.subr.bf16.mxu1 %v4153_v22 }
  0x8f   :  { %960 = vmatpush1.bf16.msra.mxu0 %v4158_v23 }
  0x90   :  { %1003 = vmatpush1.bf16.msra.mxu1 %v4165_v24  ;;  %1035 = vmatprep.subr.bf16.mxu0 %v4170_v25 }
  0x91   :  { %1082 = vmatprep.subr.bf16.mxu1 %v4177_v26 }
  0x92   :  { %3220 = vmatmul.mubr.msk.bf16.vlgmr.msra.gmra.mxu0 %vm129_vm0, %v4334_v52 }
  0x93   :  { %3221 = vmatmul.mubr.msk.bf16.vlgmr.msra.gmra.mxu1 %vm129_vm0, %v4329_v51  ;;  %1036 = vmatpush1.bf16.msra.mxu0 %v4190_v29 }
  0x94   :  { %1083 = vmatpush1.bf16.msra.mxu1 %v4197_v30  ;;  %1037 = vmatprep.subr.bf16.mxu0 %v4204_v31 }
  0x95   :  { %1084 = vmatprep.subr.bf16.mxu1 %v4209_v32  ;;  %1063 = vmatprep.mubr.bf16.mxu0 %v5499_v28 }
  0x96   :  { %1110 = vmatprep.mubr.bf16.mxu1 %v5499_v28 }
  0x97   :  { %1038 = vmatpush1.bf16.msra.mxu0 %v4217_v33 }
  0x98   :  { %1085 = vmatpush1.bf16.msra.mxu1 %v4224_v34  ;;  %1039 = vmatprep.subr.bf16.mxu0 %v4229_v35 }
  0x99   :  { %1086 = vmatprep.subr.bf16.mxu1 %v4236_v36 }
  0x9b   :  { %1040 = vmatpush1.bf16.msra.mxu0 %v4243_v37 }
  0x9c   :  { %1087 = vmatpush1.bf16.msra.mxu1 %v4250_v38  ;;  %1041 = vmatprep.subr.bf16.mxu0 %v4257_v39 }
  0x9d   :  { %1088 = vmatprep.subr.bf16.mxu1 %v4262_v40 }
  0x9f   :  { %1042 = vmatpush1.bf16.msra.mxu0 %v4267_v41 }
  0xa0   :  { %1089 = vmatpush1.bf16.msra.mxu1 %v4272_v42  ;;  %1043 = vmatprep.subr.bf16.mxu0 %v4279_v43 }
  0xa1   :  { %1090 = vmatprep.subr.bf16.mxu1 %v4286_v44 }
  0xa3   :  { %1044 = vmatpush1.bf16.msra.mxu0 %v4291_v45 }
  0xa4   :  { %1091 = vmatpush1.bf16.msra.mxu1 %v4296_v46  ;;  %1045 = vmatprep.subr.bf16.mxu0 %v4303_v47 }
  0xa5   :  { %1092 = vmatprep.subr.bf16.mxu1 %v4310_v48 }
  0xa7   :  { %1046 = vmatpush1.bf16.msra.mxu0 %v4315_v49 }
  0xa8   :  { %1093 = vmatpush1.bf16.msra.mxu1 %v4322_v50  ;;  %1140 = vmatprep.subr.bf16.mxu0 %v4339_v53 }
  0xa9   :  { %1187 = vmatprep.subr.bf16.mxu1 %v3939_v1 }
  0xaa   :  { %3222 = vmatmul.mubr.msk.bf16.vlgmr.msra.gmra.mxu0 %vm129_vm0, %v4429_v15 }
  0xab   :  { %3223 = vmatmul.mubr.msk.bf16.vlgmr.msra.gmra.mxu1 %vm129_vm0, %v4494_v59  ;;  %1141 = vmatpush1.bf16.msra.mxu0 %v4344_v54 }
  0xac   :  { %1188 = vmatpush1.bf16.msra.mxu1 %v4041_v3  ;;  %1142 = vmatprep.subr.bf16.mxu0 %v4349_v55  ;;  %v5501_v3 = vld [vmem:[#allocation6_spill] sm:$0xff] }
  0xad   :  { %1189 = vmatprep.subr.bf16.mxu1 %v4052_v5  ;;  %1168 = vmatprep.mubr.bf16.mxu0 %v5499_v28  ;;  %v1132_v5 = vrot.slane %v4587_v4, 1  ;;  %5503 = vst [vmem:[#allocation6_spill] sm:$0xff] %v4686_v18 }
  0xae   :  { %1215 = vmatprep.mubr.bf16.mxu1 %v5499_v28 }
  0xaf   :  { %1143 = vmatpush1.bf16.msra.mxu0 %v4358_v56 }
  0xb0   :  { %1190 = vmatpush1.bf16.msra.mxu1 %v4064_v7  ;;  %1144 = vmatprep.subr.bf16.mxu0 %v4367_v57  ;;  %v3941_v7 = vld [vmem:[%s5439_s1 + $0x50] ss:$8 sps:$4 sm:$0xff]  }
  0xb1   :  { %1191 = vmatprep.subr.bf16.mxu1 %v4076_v9  ;;  %v3943_v9 = vld [vmem:[%s5439_s1 + $0x40] ss:$8 sps:$4 sm:$0xff]  }
  0xb3   :  { %1145 = vmatpush1.bf16.msra.mxu0 %v4376_v58 }
  0xb4   :  { %1192 = vmatpush1.bf16.msra.mxu1 %v4086_v11  ;;  %1146 = vmatprep.subr.bf16.mxu0 %v5501_v3  ;;  %v3945_v11 = vld [vmem:[%s5439_s1 + $0x30] ss:$8 sps:$4 sm:$0xff]  }
  0xb5   :  { %1193 = vmatprep.subr.bf16.mxu1 %v4098_v13  ;;  %v3947_v13 = vld [vmem:[%s5439_s1 + $0x20] ss:$8 sps:$4 sm:$0xff]  }
  0xb7   :  { %1147 = vmatpush1.bf16.msra.mxu0 %v4392_v60 }
  0xb8   :  { %1194 = vmatpush1.bf16.msra.mxu1 %v5500_v0  ;;  %1148 = vmatprep.subr.bf16.mxu0 %v4397_v61 }
  0xb9   :  { %1195 = vmatprep.subr.bf16.mxu1 %v4122_v17 }
  0xbb   :  { %1149 = vmatpush1.bf16.msra.mxu0 %v4406_v62 }
  0xbc   :  { %1196 = vmatpush1.bf16.msra.mxu1 %v4134_v19  ;;  %1150 = vmatprep.subr.bf16.mxu0 %v4411_v63  ;;  %v4692_v19 = vld [vmem:[%s5441_s3 + $0x64] ss:$8 sps:$4 sm:$0xff]  }
  0xbd   :  { %1197 = vmatprep.subr.bf16.mxu1 %v4146_v21  ;;  %5504 = vst [vmem:[#allocation7_spill] sm:$0xff] %v4692_v19  ;;  %v4716_v21 = vld [vmem:[%s5441_s3 + $0x50] ss:$8 sps:$4 sm:$0xff]  }
  0xbe   :  { %5507 = vst [vmem:[#allocation10_spill] sm:$0xff] %v4716_v21 }
  0xbf   :  { %1151 = vmatpush1.bf16.msra.mxu0 %v4423_v2 }
  0xc0   :  { %1198 = vmatpush1.bf16.msra.mxu1 %v4158_v23  ;;  %1230 = vmatprep.subr.bf16.mxu0 %v3940_v6  ;;  %v4728_v23 = vld [vmem:[%s5441_s3 + $0x40] ss:$8 sps:$4 sm:$0xff]  }
  0xc1   :  { %1273 = vmatprep.subr.bf16.mxu1 %v4170_v25  ;;  %5509 = vst [vmem:[#allocation12_spill] sm:$0xff] %v4728_v23  ;;  %v4740_v25 = vld [vmem:[%s5441_s3 + $0x30] ss:$8 sps:$4 sm:$0xff]   ;;  %v4852_v6 = vld [vmem:[%s5441_s3 + $0xc0] ss:$8 sps:$4 sm:$0xff]  }
  0xc2   :  { %3227 = vmatmul.mubr.msk.bf16.vlgmr.msra.gmra.mxu0 %vm129_vm0, %v1132_v5  ;;  %5511 = vst [vmem:[#allocation14_spill] sm:$0xff] %v4740_v25 }
  0xc3   :  { %3228 = vmatmul.mubr.msk.bf16.vlgmr.msra.gmra.mxu1 %vm129_vm0, %v4429_v15  ;;  %1231 = vmatpush1.bf16.msra.mxu0 %v3941_v7  ;;  %v3770_v15 = vld [vmem:[%s5438_s0 + $0x18] sm:$0xfe]  }
  0xc4   :  { %1274 = vmatpush1.bf16.msra.mxu1 %v4190_v29  ;;  %1232 = vmatprep.subr.bf16.mxu0 %v3942_v8  ;;  %v1370_v17 = vrot.slane %v3770_v15, 1 }
  0xc5   :  { %1275 = vmatprep.subr.bf16.mxu1 %v4204_v31  ;;  %1258 = vmatprep.mubr.bf16.mxu0 %v5499_v28  ;;  %v4756_v31 = vld [vmem:[%s5441_s3 + $0x20] ss:$8 sps:$4 sm:$0xff]  }
  0xc6   :  { %1301 = vmatprep.mubr.bf16.mxu1 %v5499_v28  ;;  %5513 = vst [vmem:[#allocation16_spill] sm:$0xff] %v4756_v31 }
  0xc7   :  { %1233 = vmatpush1.bf16.msra.mxu0 %v3943_v9  ;;  %v924_v9 = vlaneseq }
  0xc8   :  { %1276 = vmatpush1.bf16.msra.mxu1 %v4217_v33  ;;  %1234 = vmatprep.subr.bf16.mxu0 %v3944_v10  ;;  %v4859_v10 = vld [vmem:[%s5441_s3 + $0xb4] ss:$8 sps:$4 sm:$0xff]  }
  0xc9   :  { %1277 = vmatprep.subr.bf16.mxu1 %v4229_v35  ;;  %v4768_v35 = vld [vmem:[%s5441_s3 + $0x10] ss:$8 sps:$4 sm:$0xff]  }
  0xca   :  { %5515 = vst [vmem:[#allocation18_spill] sm:$0xff] %v4768_v35 }
  0xcb   :  { %1235 = vmatpush1.bf16.msra.mxu0 %v3945_v11 }
  0xcc   :  { %1278 = vmatpush1.bf16.msra.mxu1 %v4243_v37  ;;  %1236 = vmatprep.subr.bf16.mxu0 %v3946_v12  ;;  %v4864_v12 = vld [vmem:[%s5441_s3 + $0xb0] ss:$8 sps:$4 sm:$0xff]  }
  0xcd   :  { %1279 = vmatprep.subr.bf16.mxu1 %v4257_v39  ;;  %v4780_v39 = vld [vmem:[%s5441_s3] ss:$8 sps:$4 sm:$0xff]  }
  0xce   :  { %5517 = vst [vmem:[#allocation20_spill] sm:$0xff] %v4780_v39 }
  0xcf   :  { %1237 = vmatpush1.bf16.msra.mxu0 %v3947_v13 }
  0xd0   :  { %1280 = vmatpush1.bf16.msra.mxu1 %v4267_v41  ;;  %1238 = vmatprep.subr.bf16.mxu0 %v3948_v14 }
  0xd1   :  { %1281 = vmatprep.subr.bf16.mxu1 %v4279_v43 }
  0xd3   :  { %1239 = vmatpush1.bf16.msra.mxu0 %v4139_v20  ;;  %v4709_v20 = vld [vmem:[%s5441_s3 + $0x54] ss:$8 sps:$4 sm:$0xff]  }
  0xd4   :  { %1282 = vmatpush1.bf16.msra.mxu1 %v4291_v45  ;;  %1240 = vmatprep.subr.bf16.mxu0 %v4153_v22  ;;  %5506 = vst [vmem:[#allocation9_spill] sm:$0xff] %v4709_v20  ;;  %v4722_v22 = vld [vmem:[%s5441_s3 + $0x44] ss:$8 sps:$4 sm:$0xff]  }
  0xd5   :  { %1283 = vmatprep.subr.bf16.mxu1 %v4303_v47  ;;  %5508 = vst [vmem:[#allocation11_spill] sm:$0xff] %v4722_v22 }
  0xd7   :  { %1241 = vmatpush1.bf16.msra.mxu0 %v4165_v24  ;;  %v4734_v24 = vld [vmem:[%s5441_s3 + $0x34] ss:$8 sps:$4 sm:$0xff]  }
  0xd8   :  { %1284 = vmatpush1.bf16.msra.mxu1 %v4315_v49  ;;  %1320 = vmatprep.subr.bf16.mxu0 %v4177_v26  ;;  %5510 = vst [vmem:[#allocation13_spill] sm:$0xff] %v4734_v24  ;;  %v4746_v26 = vld [vmem:[%s5441_s3 + $0x24] ss:$8 sps:$4 sm:$0xff]  }
  0xd9   :  { %1378 = vmatprep.subr.bf16.mxu1 %v4339_v53  ;;  %5512 = vst [vmem:[#allocation15_spill] sm:$0xff] %v4746_v26 }
  0xda   :  { %3229 = vmatmul.mubr.msk.bf16.vlgmr.msra.gmra.mxu0 %vm129_vm0, %v4334_v52  ;;  %v4748_v29 = vpop.f32.mrf.mxu0 }
  0xdb   :  { %3230 = vmatmul.mubr.msk.bf16.vlgmr.msra.gmra.mxu1 %vm129_vm0, %v4494_v59  ;;  %1321 = vmatpush1.bf16.msra.mxu0 %v4197_v30  ;;  %v4750_v30 = vpop.f32.mrf.mxu1 }
  0xdc   :  { %1379 = vmatpush1.bf16.msra.mxu1 %v4344_v54  ;;  %1322 = vmatprep.subr.bf16.mxu0 %v4209_v32  ;;  %v4762_v32 = vld [vmem:[%s5441_s3 + $0x14] ss:$8 sps:$4 sm:$0xff]   ;;  %v169_v33 = vpop.f32.mrf.mxu0  ;;  %v4801_v54 = vld [vmem:[%s5441_s3 + $0xf0] ss:$8 sps:$4 sm:$0xff]   ;;  %v279_v13 = vadd.f32 %v4750_v30, %v4748_v29  ;;  %v4880_v30 = vld [vmem:[%s5441_s3 + $0xa0] ss:$8 sps:$4 sm:$0xff]  }
  0xdd   :  { %1380 = vmatprep.subr.bf16.mxu1 %v4349_v55  ;;  %1348 = vmatprep.mubr.bf16.mxu0 %v5499_v28  ;;  %5514 = vst [vmem:[#allocation17_spill] sm:$0xff] %v4762_v32  ;;  %v4806_v55 = vld [vmem:[%s5441_s3 + $0xf4] ss:$8 sps:$4 sm:$0xff]  }
  0xde   :  { %1406 = vmatprep.mubr.bf16.mxu1 %v5499_v28  ;;  %v171_v37 = vpop.f32.mrf.mxu0 }
  0xdf   :  { %1323 = vmatpush1.bf16.msra.mxu0 %v4224_v34  ;;  %v280_v34 = vpop.f32.mrf.mxu1 }
  0xe0   :  { %1381 = vmatpush1.bf16.msra.mxu1 %v4358_v56  ;;  %1324 = vmatprep.subr.bf16.mxu0 %v4236_v36  ;;  %v4774_v36 = vld [vmem:[%s5441_s3 + $0x4] ss:$8 sps:$4 sm:$0xff]   ;;  %v4811_v56 = vld [vmem:[%s5441_s3 + $0x1f4] ss:$8 sps:$4 sm:$0xff]   ;;  %v281_v14 = vadd.f32 %v280_v34, %v169_v33 }
  0xe1   :  { %1382 = vmatprep.subr.bf16.mxu1 %v4367_v57  ;;  %5516 = vst [vmem:[#allocation19_spill] sm:$0xff] %v4774_v36  ;;  %5518 = vst [vmem:[#allocation21_spill] sm:$0xff] %v4811_v56  ;;  %v4816_v57 = vld [vmem:[%s5441_s3 + $0xe4] ss:$8 sps:$4 sm:$0xff]  }
  0xe3   :  { %1325 = vmatpush1.bf16.msra.mxu0 %v4250_v38  ;;  %v282_v38 = vpop.f32.mrf.mxu1 }
  0xe4   :  { %1383 = vmatpush1.bf16.msra.mxu1 %v4376_v58  ;;  %1326 = vmatprep.subr.bf16.mxu0 %v4262_v40  ;;  %v173_v40 = vpop.f32.mrf.mxu0 }
  0xe5   :  { %1384 = vmatprep.subr.bf16.mxu1 %v5501_v3  ;;  %v284_v41 = vpop.f32.mrf.mxu1 }
  0xe6   :  { %v285_v33 = vadd.f32 %v284_v41, %v173_v40  ;;  %v4891_v41 = vld [vmem:[%s5441_s3 + $0x94] ss:$8 sps:$4 sm:$0xff]  }
  0xe7   :  { %1327 = vmatpush1.bf16.msra.mxu0 %v4272_v42  ;;  %5520 = vst [vmem:[#allocation23_spill] sm:$0xff] %v4891_v41 }
  0xe8   :  { %1385 = vmatpush1.bf16.msra.mxu1 %v4392_v60  ;;  %1328 = vmatprep.subr.bf16.mxu0 %v4286_v44  ;;  %v4826_v60 = vld [vmem:[%s5441_s3 + $0xe0] ss:$8 sps:$4 sm:$0xff]  }
  0xe9   :  { %1386 = vmatprep.subr.bf16.mxu1 %v4397_v61  ;;  %v4832_v61 = vld [vmem:[%s5441_s3 + $0xd4] ss:$8 sps:$4 sm:$0xff]  }
  0xeb   :  { %1329 = vmatpush1.bf16.msra.mxu0 %v4296_v46 }
  0xec   :  { %1387 = vmatpush1.bf16.msra.mxu1 %v4406_v62  ;;  %1330 = vmatprep.subr.bf16.mxu0 %v4310_v48 }
  0xed   :  { %1388 = vmatprep.subr.bf16.mxu1 %v4411_v63 }
  0xef   :  { %1331 = vmatpush1.bf16.msra.mxu0 %v4322_v50 }
  0xf0   :  { %1389 = vmatpush1.bf16.msra.mxu1 %v4423_v2  ;;  %v4702_v2 = vld [vmem:[%s5441_s3 + $0x60] ss:$8 sps:$4 sm:$0xff]   ;;  %1549 = vmatprep.subr.bf16.mxu0 %v4806_v55 }
  0xf1   :  { %1672 = vmatprep.subr.bf16.mxu1 %v4679_v16  ;;  %5505 = vst [vmem:[#allocation8_spill] sm:$0xff] %v4702_v2 }
  0xf2   :  { %3231 = vmatmul.mubr.msk.bf16.vlgmr.msra.gmra.mxu0 %vm129_vm0, %v1132_v5  ;;  %v405_v42 = vpop.f32.mrf.mxu0  ;;  %v4847_v5 = vld [vmem:[%s5441_s3 + $0xc4] ss:$8 sps:$4 sm:$0xff]  }
  0xf3   :  { %3235 = vmatmul.mubr.msk.bf16.vlgmr.msra.gmra.mxu1 %vm129_vm0, %v1370_v17  ;;  %1581 = vmatprep.mubr.bf16.mxu0 %v5499_v28  ;;  %v4784_v43 = vpop.f32.mrf.mxu1  ;;  %v283_v17 = vadd.f32 %v282_v38, %v171_v37 }
  0xf4   :  { %1673 = vmatpush1.bf16.msra.mxu1 %v4686_v18  ;;  %1704 = vmatprep.mubr.bf16.mxu1 %v5499_v28  ;;  %v407_v44 = vpop.f32.mrf.mxu0 }
  0xf5   :  { %1674 = vmatprep.subr.bf16.mxu1 %v4692_v19  ;;  %v4786_v45 = vpop.f32.mrf.mxu1  ;;  %1550 = vmatpush1.bf16.msra.mxu0 %v4801_v54 }
  0xf6   :  { %v409_v46 = vpop.f32.mrf.mxu0  ;;  %1551 = vmatprep.subr.bf16.mxu0 %v4816_v57 }
  0xf7   :  { %v4788_v47 = vpop.f32.mrf.mxu1  ;;  %v416_v34 = vadd.f32 %v409_v46, %v283_v17 }
  0xf8   :  { %1675 = vmatpush1.bf16.msra.mxu1 %v4702_v2  ;;  %v4790_v48 = vpop.f32.mrf.mxu0 }
  0xf9   :  { %1676 = vmatprep.subr.bf16.mxu1 %v4709_v20  ;;  %v4792_v49 = vpop.f32.mrf.mxu1  ;;  %1552 = vmatpush1.bf16.msra.mxu0 %v4826_v60 }
  0xfa   :  { %1553 = vmatprep.subr.bf16.mxu0 %v4832_v61 }
  0xfc   :  { %1677 = vmatpush1.bf16.msra.mxu1 %v4716_v21 }
  0xfd   :  { %1678 = vmatprep.subr.bf16.mxu1 %v4722_v22  ;;  %1554 = vmatpush1.bf16.msra.mxu0 %v4840_v27 }
  0xfe   :  { %1555 = vmatprep.subr.bf16.mxu0 %v4847_v5 }
 0x100   :  { %1679 = vmatpush1.bf16.msra.mxu1 %v4728_v23 }
 0x101   :  { %1680 = vmatprep.subr.bf16.mxu1 %v4734_v24  ;;  %1556 = vmatpush1.bf16.msra.mxu0 %v4852_v6 }
 0x102   :  { %1557 = vmatprep.subr.bf16.mxu0 %v4859_v10 }
 0x104   :  { %1681 = vmatpush1.bf16.msra.mxu1 %v4740_v25 }
 0x105   :  { %1682 = vmatprep.subr.bf16.mxu1 %v4746_v26  ;;  %1558 = vmatpush1.bf16.msra.mxu0 %v4864_v12 }
 0x108   :  { %1683 = vmatpush1.bf16.msra.mxu1 %v4756_v31 }
 0x109   :  { %1684 = vmatprep.subr.bf16.mxu1 %v4762_v32 }
 0x10a   :  { %v4794_v50 = vpop.f32.mrf.mxu0 }
 0x10b   :  { %v714_v51 = vpop.f32.mrf.mxu1 }
 0x10c   :  { %1685 = vmatpush1.bf16.msra.mxu1 %v4768_v35  ;;  %v4796_v52 = vpop.f32.mrf.mxu0  ;;  %v4870_v35 = vshrl.u32 %v924_v9, 7 }
 0x10d   :  { %1686 = vmatprep.subr.bf16.mxu1 %v4774_v36  ;;  %v716_v53 = vpop.f32.mrf.mxu1 }
 0x10e   :  { %v4819_v58 = vpop.f32.mrf.mxu0  ;;  %5519 = vst [vmem:[#allocation22_spill] sm:$0xff] %v4870_v35 }
 0x10f   :  { %v718_v59 = vpop.f32.mrf.mxu1 }
 0x110   :  { %1687 = vmatpush1.bf16.msra.mxu1 %v4780_v39  ;;  %v4834_v62 = vpop.f32.mrf.mxu0 }
 0x111   :  { %1962 = vmatprep.subr.bf16.mxu1 %v4811_v56  ;;  %v720_v63 = vpop.f32.mrf.mxu1  ;;  %v414_v56 = vadd.f32 %v405_v42, %v279_v13  ;;  %v5460_v42 = vsub.s32 1, %v4870_v35 }
 0x122   :  { %v757_v0 = vpop.f32.mrf.mxu0 }
 0x123   :  { %v800_v1 = vpop.f32.mrf.mxu1  ;;  %v758_v11 = vadd.f32 %v757_v0, %v714_v51  ;;  %v4875_v51 = vld [vmem:[%s5441_s3 + $0xa4] ss:$8 sps:$4 sm:$0xff]   ;;  %v415_v0 = vadd.f32 %v407_v44, %v281_v14  ;;  %v545_v44 = vadd.f32 %v4784_v43, %v414_v56  ;;  %v547_v56 = vadd.f32 %v4788_v47, %v416_v34 }
 0x124   :  { %v759_v3 = vpop.f32.mrf.mxu0  ;;  %1559 = vmatprep.subr.bf16.mxu0 %v4875_v51 }
 0x125   :  { %v802_v4 = vpop.f32.mrf.mxu1  ;;  %v760_v15 = vadd.f32 %v759_v3, %v716_v53  ;;  %v809_v32 = vadd.f32 %v800_v1, %v758_v11  ;;  %1560 = vmatpush1.bf16.msra.mxu0 %v4880_v30  ;;  %v5459_v1 = vsub.s32 0, %v4870_v35  ;;  %v546_v46 = vadd.f32 %v4786_v45, %v415_v0 }
 0x126   :  { %v761_v7 = vpop.f32.mrf.mxu0  ;;  %1561 = vmatprep.subr.bf16.mxu0 %v4891_v41  ;;  %v678_v47 = vadd.f32 %v4819_v58, %v547_v56 }
 0x127   :  { %v804_v8 = vpop.f32.mrf.mxu1  ;;  %v762_v29 = vadd.f32 %v761_v7, %v718_v59  ;;  %v810_v53 = vadd.f32 %v802_v4, %v760_v15  ;;  %v417_v59 = vadd.f32 %v4790_v48, %v285_v33  ;;  %v4900_v48 = vld [vmem:[%s5441_s3 + $0x90] ss:$8 sps:$4 sm:$0xff]   ;;  %v677_v13 = vadd.f32 %v4796_v52, %v546_v46  ;;  %v4920_v33 = vld [vmem:[%s5441_s3 + $0x84] ss:$8 sps:$4 sm:$0xff]  }
 0x128   :  { %v763_v39 = vpop.f32.mrf.mxu0  ;;  %5521 = vst [vmem:[#allocation24_spill] sm:$0xff] %v4900_v48  ;;  %5522 = vst [vmem:[#allocation25_spill] sm:$0xff] %v4920_v33 }
 0x129   :  { %v806_v36 = vpop.f32.mrf.mxu1  ;;  %v764_v3 = vadd.f32 %v763_v39, %v720_v63  ;;  %v811_v4 = vadd.f32 %v804_v8, %v762_v29  ;;  %v676_v63 = vadd.f32 %v4794_v50, %v545_v44  ;;  %1562 = vmatpush1.bf16.msra.mxu0 %v4900_v48  ;;  %v548_v0 = vadd.f32 %v4792_v49, %v417_v59  ;;  %v4925_v49 = vld [vmem:[%s5441_s3 + $0x80] ss:$8 sps:$4 sm:$0xff]   ;;  %v4934_v44 = vld [vmem:[%s5441_s3 + $0x174] ss:$8 sps:$4 sm:$0xff]  }
 0x12a   :  { %5523 = vst [vmem:[#allocation26_spill] sm:$0xff] %v4925_v49  ;;  %1563 = vmatprep.subr.bf16.mxu0 %v4920_v33  ;;  %5524 = vst [vmem:[#allocation27_spill] sm:$0xff] %v4934_v44 }
 0x12b   :  { %v812_v14 = vadd.f32 %v806_v36, %v764_v3 }
 0x12d   :  { %1564 = vmatpush1.bf16.msra.mxu0 %v4925_v49 }
 0x12e   :  { %1815 = vmatprep.subr.bf16.mxu0 %v4934_v44 }
 0x13a   :  { %v847_v37 = vpop.f32.mrf.mxu0 }
 0x13b   :  { %v905_v38 = vpop.f32.mrf.mxu1  ;;  %v856_v9 = vadd.f32 %v847_v37, %v809_v32  ;;  %v922_v32 = vld [vmem:[%s5440_s2] sm:$0x3]  ;;  %s3080_s2 = sshll.u32 %s3974_s12, 4  ;;  %s3081_s2 = int_to_ptr.vmem [resolvable:$true] %s3080_s2 }
 0x13c   :  { %v849_v7 = vpop.f32.mrf.mxu0  ;;  %v4906_v11 = vrot.slane %v922_v32, %v5460_v42  ;;  %v4915_v50 = vrot.slane %v922_v32, %v5459_v1  ;;  %p3954_p1 = scmp.lt.s32.totalorder %s3081_s2, %s3081_s2 }
 0x13d   :  { %v907_v40 = vpop.f32.mrf.mxu1  ;;  %v914_v39 = vadd.f32 %v905_v38, %v856_v9  ;;  %v857_v43 = vadd.f32 %v849_v7, %v810_v53  ;;  %v679_v38 = vadd.f32 %v4834_v62, %v548_v0  ;;  %v4982_v0 = vld [vmem:[%s5441_s3 + $0x1c0] ss:$8 sps:$4 sm:$0xff]  }
 0x13e   :  { %v851_v45 = vpop.f32.mrf.mxu0  ;;  %5532 = vst [vmem:[#allocation35_spill] sm:$0xff] %v4982_v0 }
 0x13f   :  { %v909_v8 = vpop.f32.mrf.mxu1  ;;  %v915_v15 = vadd.f32 %v907_v40, %v857_v43  ;;  %v858_v17 = vadd.f32 %v851_v45, %v811_v4  ;;  %v918_v52 = vmax.f32 %v676_v63, %v914_v39  ;;  %v4943_v63 = vld [vmem:[%s5441_s3 + $0x1f0] ss:$8 sps:$4 sm:$0xff]  }
 0x140   :  { %v853_v29 = vpop.f32.mrf.mxu0  ;;  %5525 = vst [vmem:[#allocation28_spill] sm:$0xff] %v4943_v63 }
 0x141   :  { %v919_v36 = vmax.f32 %v677_v13, %v915_v15  ;;  %v916_v34 = vadd.f32 %v909_v8, %v858_v17  ;;  %v859_v37 = vadd.f32 %v853_v29, %v812_v14  ;;  %v911_v58 = vpop.f32.mrf.mxu1  ;;  %v934_v59 = vadd.f32 %v4915_v50, %v918_v52  ;;  %v4950_v8 = vld [vmem:[%s5441_s3 + $0x1e4] ss:$8 sps:$4 sm:$0xff]   ;;  %v4957_v13 = vld [vmem:[%s5441_s3 + $0x1e0] ss:$8 sps:$4 sm:$0xff]   ;;  %v4964_v14 = vld [vmem:[%s5441_s3 + $0x1d4] ss:$8 sps:$4 sm:$0xff]  }
 0x142   :  { %5527 = vst [vmem:[#allocation30_spill] sm:$0xff] %v4950_v8  ;;  %5528 = vst [vmem:[#allocation31_spill] sm:$0xff] %v4957_v13  ;;  %v4970_v15 = vld [vmem:[%s5441_s3 + $0x1d0] ss:$8 sps:$4 sm:$0xff]   ;;  %v4976_v17 = vld [vmem:[%s5441_s3 + $0x1c4] ss:$8 sps:$4 sm:$0xff]  }
 0x143   :  { %v935_v53 = vadd.f32 %v4906_v11, %v919_v36  ;;  %v920_v3 = vmax.f32 %v678_v47, %v916_v34  ;;  %v917_v9 = vadd.f32 %v911_v58, %v859_v37  ;;  %v938_v4 = vmax.f32 %v934_v59, 0.0  ;;  %5529 = vst [vmem:[#allocation32_spill] sm:$0xff] %v4964_v14  ;;  %5530 = vst [vmem:[#allocation33_spill] sm:$0xff] %v4970_v15  ;;  %v4988_v47 = vld [vmem:[%s5441_s3 + $0x1b4] ss:$8 sps:$4 sm:$0xff]  }
 0x144   :  { %5531 = vst [vmem:[#allocation34_spill] sm:$0xff] %v4976_v17  ;;  %5533 = vst [vmem:[#allocation36_spill] sm:$0xff] %v4988_v47  ;;  %v4994_v29 = vld [vmem:[%s5441_s3 + $0x1b0] ss:$8 sps:$4 sm:$0xff]   ;;  %v5000_v52 = vld [vmem:[%s5441_s3 + $0x1a4] ss:$8 sps:$4 sm:$0xff]  }
 0x145   :  { %v936_v7 = vadd.f32 %v4915_v50, %v920_v3  ;;  %v921_v40 = vmax.f32 %v679_v38, %v917_v9  ;;  %v939_v46 = vmax.f32 %v935_v53, 0.0  ;;  %5534 = vst [vmem:[#allocation37_spill] sm:$0xff] %v4994_v29  ;;  %5535 = vst [vmem:[#allocation38_spill] sm:$0xff] %v5000_v52  ;;  %v5006_v36 = vld [vmem:[%s5441_s3 + $0x1a0] ss:$8 sps:$4 sm:$0xff]  }
 0x146   :  { %5536 = vst [vmem:[#allocation39_spill] sm:$0xff] %v5006_v36  ;;  %v5012_v34 = vld [vmem:[%s5441_s3 + $0x194] ss:$8 sps:$4 sm:$0xff]   ;;  %v5018_v37 = vld [vmem:[%s5441_s3 + $0x190] ss:$8 sps:$4 sm:$0xff]  }
 0x147   :  { %v937_v62 = vadd.f32 %v4906_v11, %v921_v40  ;;  %v940_v39 = vmax.f32 %v936_v7, 0.0  ;;  %v942_v43 = vmax.f32 %v938_v4, %v939_v46  ;;  %5537 = vst [vmem:[#allocation40_spill] sm:$0xff] %v5012_v34  ;;  %5538 = vst [vmem:[#allocation41_spill] sm:$0xff] %v5018_v37  ;;  %v5024_v58 = vld [vmem:[%s5441_s3 + $0x184] ss:$8 sps:$4 sm:$0xff]  }
 0x148   :  { %5539 = vst [vmem:[#allocation42_spill] sm:$0xff] %v5024_v58  ;;  %v5030_v38 = vld [vmem:[%s5441_s3 + $0x180] ss:$8 sps:$4 sm:$0xff]  }
 0x149   :  { %v941_v32 = vmax.f32 %v937_v62, 0.0  ;;  %5540 = vst [vmem:[#allocation43_spill] sm:$0xff] %v5030_v38 }
 0x14b   :  { %v943_v56 = vmax.f32 %v940_v39, %v941_v32 }
 0x14d   :  { %v4945_v45 = vpack.c.bf16 %v943_v56, %v942_v43 }
 0x14f   :  { %5526 = vst [vmem:[#allocation29_spill] sm:$0xff] %v4945_v45  ;;  %1705 = vmatmul.mubr.bf16.vlgmr.msra.gmra.mxu1 %v4945_v45 }
 0x150   :  { %1963 = vmatpush1.bf16.msra.mxu1 %v4943_v63  ;;  %1994 = vmatprep.mubr.bf16.mxu1 %v5499_v28 }
 0x151   :  { %1964 = vmatprep.subr.bf16.mxu1 %v4950_v8 }
 0x152   :  { %v979_v53 = vpop.f32.mrf.mxu0 }
 0x153   :  { %v1022_v3 = vpop.f32.mrf.mxu1 }
 0x154   :  { %1965 = vmatpush1.bf16.msra.mxu1 %v4957_v13  ;;  %v981_v9 = vpop.f32.mrf.mxu0  ;;  %v1023_v63 = vadd.f32 %v1022_v3, %v979_v53 }
 0x155   :  { %1966 = vmatprep.subr.bf16.mxu1 %v4964_v14  ;;  %v1024_v59 = vpop.f32.mrf.mxu1 }
 0x156   :  { %v983_v7 = vpop.f32.mrf.mxu0  ;;  %v1025_v31 = vadd.f32 %v1024_v59, %v981_v9 }
 0x157   :  { %v1026_v40 = vpop.f32.mrf.mxu1 }
 0x158   :  { %1967 = vmatpush1.bf16.msra.mxu1 %v4970_v15  ;;  %v985_v46 = vpop.f32.mrf.mxu0  ;;  %v1027_v25 = vadd.f32 %v1026_v40, %v983_v7  ;;  %v3854_v40 = vld [vmem:[%s5441_s3 + $0x144] ss:$8 sps:$4 sm:$0xff]  }
 0x159   :  { %1968 = vmatprep.subr.bf16.mxu1 %v4976_v17  ;;  %v1028_v62 = vpop.f32.mrf.mxu1 }
 0x15a   :  { %v1029_v19 = vadd.f32 %v1028_v62, %v985_v46  ;;  %v5541_v46 = vld [vmem:[#allocation23_spill] sm:$0xff]  ;;  %v5542_v62 = vld [vmem:[#allocation24_spill] sm:$0xff] }
 0x15c   :  { %1969 = vmatpush1.bf16.msra.mxu1 %v4982_v0 }
 0x15d   :  { %1970 = vmatprep.subr.bf16.mxu1 %v4988_v47 }
 0x160   :  { %1971 = vmatpush1.bf16.msra.mxu1 %v4994_v29 }
 0x161   :  { %1972 = vmatprep.subr.bf16.mxu1 %v5000_v52 }
 0x164   :  { %1973 = vmatpush1.bf16.msra.mxu1 %v5006_v36 }
 0x165   :  { %1974 = vmatprep.subr.bf16.mxu1 %v5012_v34 }
 0x168   :  { %1975 = vmatpush1.bf16.msra.mxu1 %v5018_v37 }
 0x169   :  { %1976 = vmatprep.subr.bf16.mxu1 %v5024_v58 }
 0x16a   :  { %v1065_v4 = vpop.f32.mrf.mxu0 }
 0x16b   :  { %v1112_v39 = vpop.f32.mrf.mxu1  ;;  %v1074_v24 = vadd.f32 %v1065_v4, %v1023_v63  ;;  %v5543_v4 = vld [vmem:[#allocation25_spill] sm:$0xff] }
 0x16c   :  { %1977 = vmatpush1.bf16.msra.mxu1 %v5030_v38  ;;  %v1067_v32 = vpop.f32.mrf.mxu0 }
 0x16d   :  { %2155 = vmatprep.subr.bf16.mxu1 %v4806_v55  ;;  %v1114_v43 = vpop.f32.mrf.mxu1  ;;  %v1075_v21 = vadd.f32 %v1067_v32, %v1025_v31  ;;  %v1121_v48 = vadd.f32 %v1112_v39, %v1074_v24  ;;  %v5544_v39 = vld [vmem:[#allocation29_spill] sm:$0xff] }
 0x16e   :  { %v1069_v56 = vpop.f32.mrf.mxu0  ;;  %v1733_v32 = vrot.slane %v5544_v39, 1 }
 0x16f   :  { %v1116_v1 = vpop.f32.mrf.mxu1  ;;  %v1076_v18 = vadd.f32 %v1069_v56, %v1027_v25  ;;  %v1122_v53 = vadd.f32 %v1114_v43, %v1075_v21  ;;  %v3872_v43 = vld [vmem:[%s5441_s3 + $0x264] ss:$8 sps:$4 sm:$0xff]  }
 0x170   :  { %v1071_v42 = vpop.f32.mrf.mxu0  ;;  %v5545_v56 = vld [vmem:[#allocation26_spill] sm:$0xff] }
 0x171   :  { %v1118_v35 = vpop.f32.mrf.mxu1  ;;  %v1077_v41 = vadd.f32 %v1071_v42, %v1029_v19  ;;  %v1123_v9 = vadd.f32 %v1116_v1, %v1076_v18 }
 0x173   :  { %v1124_v7 = vadd.f32 %v1118_v35, %v1077_v41 }
 0x182   :  { %v1170_v58 = vpop.f32.mrf.mxu0 }
 0x183   :  { %v1217_v38 = vpop.f32.mrf.mxu1  ;;  %v1179_v59 = vadd.f32 %v1170_v58, %v1121_v48  ;;  %v3849_v58 = vld [vmem:[%s5441_s3 + $0x150] ss:$8 sps:$4 sm:$0xff]  }
 0x184   :  { %v1172_v37 = vpop.f32.mrf.mxu0 }
 0x185   :  { %v1219_v55 = vpop.f32.mrf.mxu1 }
 0x186   :  { %v1174_v34 = vpop.f32.mrf.mxu0 }
 0x187   :  { %v1221_v36 = vpop.f32.mrf.mxu1 }
 0x188   :  { %v1176_v52 = vpop.f32.mrf.mxu0 }
 0x189   :  { %v1223_v29 = vpop.f32.mrf.mxu1  ;;  %v1182_v21 = vadd.f32 %v1176_v52, %v1124_v7  ;;  %v5547_v7 = vld [vmem:[#allocation5_spill] sm:$0xff] }
 0x19a   :  { %v1260_v47 = vpop.f32.mrf.mxu0 }
 0x19b   :  { %v1303_v0 = vpop.f32.mrf.mxu1  ;;  %v1261_v8 = vadd.f32 %v1260_v47, %v1217_v38 }
 0x19c   :  { %v1262_v17 = vpop.f32.mrf.mxu0 }
 0x19d   :  { %v1305_v15 = vpop.f32.mrf.mxu1  ;;  %v1263_v26 = vadd.f32 %v1262_v17, %v1219_v55  ;;  %v1312_v20 = vadd.f32 %v1303_v0, %v1261_v8  ;;  %v5546_v55 = vld [vmem:[#allocation27_spill] sm:$0xff] }
 0x19e   :  { %v1264_v14 = vpop.f32.mrf.mxu0 }
 0x19f   :  { %v1307_v13 = vpop.f32.mrf.mxu1  ;;  %v1265_v2 = vadd.f32 %v1264_v14, %v1221_v36  ;;  %v1313_v49 = vadd.f32 %v1305_v15, %v1263_v26  ;;  %v1180_v14 = vadd.f32 %v1172_v37, %v1122_v53  ;;  %v1181_v26 = vadd.f32 %v1174_v34, %v1123_v9  ;;  %v5057_v34 = vld [vmem:[%s5441_s3 + $0x160] ss:$8 sps:$4 sm:$0xff]   ;;  %v3851_v37 = vld [vmem:[%s5441_s3 + $0x154] ss:$8 sps:$4 sm:$0xff]   ;;  %v3873_v53 = vld [vmem:[%s5441_s3 + $0x250] ss:$8 sps:$4 sm:$0xff]  }
 0x1a0   :  { %v1266_v23 = vpop.f32.mrf.mxu0  ;;  %v3879_v9 = vld [vmem:[%s5441_s3 + $0x230] ss:$8 sps:$4 sm:$0xff]  }
 0x1a1   :  { %v1309_v22 = vpop.f32.mrf.mxu1  ;;  %v1267_v45 = vadd.f32 %v1266_v23, %v1223_v29  ;;  %v1314_v17 = vadd.f32 %v1307_v13, %v1265_v2  ;;  %v5042_v29 = vld [vmem:[%s5441_s3 + $0x170] ss:$8 sps:$4 sm:$0xff]  }
 0x1a3   :  { %v1315_v0 = vadd.f32 %v1309_v22, %v1267_v45 }
 0x1b2   :  { %v1350_v16 = vpop.f32.mrf.mxu0 }
 0x1b3   :  { %v1408_v44 = vpop.f32.mrf.mxu1  ;;  %v1359_v33 = vadd.f32 %v1350_v16, %v1312_v20 }
 0x1b4   :  { %v1352_v47 = vpop.f32.mrf.mxu0 }
 0x1b5   :  { %v1410_v38 = vpop.f32.mrf.mxu1  ;;  %v1417_v3 = vadd.f32 %v1408_v44, %v1359_v33  ;;  %v1360_v63 = vadd.f32 %v1352_v47, %v1313_v49  ;;  %v3870_v47 = vld [vmem:[%s5441_s3 + $0x260] ss:$8 sps:$4 sm:$0xff]  }
 0x1b6   :  { %v1354_v31 = vpop.f32.mrf.mxu0 }
 0x1b7   :  { %v1412_v8 = vpop.f32.mrf.mxu1  ;;  %v1418_v25 = vadd.f32 %v1410_v38, %v1360_v63  ;;  %v1361_v36 = vadd.f32 %v1354_v31, %v1314_v17  ;;  %v1421_v16 = vmax.f32 %v1179_v59, %v1417_v3  ;;  %v3875_v38 = vld [vmem:[%s5441_s3 + $0x254] ss:$8 sps:$4 sm:$0xff]   ;;  %v3878_v17 = vld [vmem:[%s5441_s3 + $0x244] ss:$8 sps:$4 sm:$0xff]   ;;  %v3876_v3 = vld [vmem:[%s5441_s3 + $0x240] ss:$8 sps:$4 sm:$0xff]  }
 0x1b8   :  { %v1356_v23 = vpop.f32.mrf.mxu0  ;;  %v3881_v63 = vld [vmem:[%s5441_s3 + $0x234] ss:$8 sps:$4 sm:$0xff]   ;;  %v3884_v59 = vld [vmem:[%s5441_s3 + $0x224] ss:$8 sps:$4 sm:$0xff]   ;;  %v3882_v31 = vld [vmem:[%s5441_s3 + $0x220] ss:$8 sps:$4 sm:$0xff]  }
 0x1b9   :  { %v1422_v20 = vmax.f32 %v1180_v14, %v1418_v25  ;;  %v1419_v19 = vadd.f32 %v1412_v8, %v1361_v36  ;;  %v1362_v24 = vadd.f32 %v1356_v23, %v1315_v0  ;;  %v1414_v42 = vpop.f32.mrf.mxu1  ;;  %v1425_v1 = vadd.f32 %v1421_v16, %v4915_v50  ;;  %v3887_v8 = vld [vmem:[%s5441_s3 + $0x214] ss:$8 sps:$4 sm:$0xff]   ;;  %v3885_v14 = vld [vmem:[%s5441_s3 + $0x210] ss:$8 sps:$4 sm:$0xff]   ;;  %v3890_v0 = vld [vmem:[%s5441_s3 + $0x204] ss:$8 sps:$4 sm:$0xff]  }
 0x1ba   :  { %v3888_v25 = vld [vmem:[%s5441_s3 + $0x200] ss:$8 sps:$4 sm:$0xff]   ;;  %v2026_v36 = vrot.slane %v5544_v39, 2  ;;  %v5549_v23 = vld [vmem:[#allocation7_spill] sm:$0xff] }
 0x1bb   :  { %v1426_v2 = vadd.f32 %v1422_v20, %v4906_v11  ;;  %v1423_v33 = vmax.f32 %v1181_v26, %v1419_v19  ;;  %v1420_v18 = vadd.f32 %v1414_v42, %v1362_v24  ;;  %v1429_v41 = vmax.f32 %v1425_v1, 0.0  ;;  %v5548_v26 = vld [vmem:[#allocation6_spill] sm:$0xff]  ;;  %v5550_v16 = vld [vmem:[#allocation8_spill] sm:$0xff]  ;;  %v5551_v20 = vld [vmem:[#allocation9_spill] sm:$0xff] }
 0x1bc   :  { %v5552_v19 = vld [vmem:[#allocation10_spill] sm:$0xff]  ;;  %v5553_v24 = vld [vmem:[#allocation11_spill] sm:$0xff]  ;;  %v5554_v42 = vld [vmem:[#allocation12_spill] sm:$0xff] }
 0x1bd   :  { %v1427_v48 = vadd.f32 %v1423_v33, %v4915_v50  ;;  %v1424_v22 = vmax.f32 %v1182_v21, %v1420_v18  ;;  %v1430_v49 = vmax.f32 %v1426_v2, 0.0  ;;  %v5049_v50 = vld [vmem:[%s5441_s3 + $0x164] ss:$8 sps:$4 sm:$0xff]   ;;  %v5557_v33 = vld [vmem:[#allocation15_spill] sm:$0xff]  ;;  %v5558_v18 = vld [vmem:[#allocation16_spill] sm:$0xff] }
 0x1be   :  { %v5555_v21 = vld [vmem:[#allocation13_spill] sm:$0xff]  ;;  %v5556_v2 = vld [vmem:[#allocation14_spill] sm:$0xff] }
 0x1bf   :  { %v1428_v35 = vadd.f32 %v1424_v22, %v4906_v11  ;;  %v1431_v44 = vmax.f32 %v1427_v48, 0.0  ;;  %v1433_v13 = vmax.f32 %v1429_v41, %v1430_v49  ;;  %v5559_v1 = vld [vmem:[#allocation17_spill] sm:$0xff]  ;;  %v5560_v48 = vld [vmem:[#allocation18_spill] sm:$0xff]  ;;  %v5561_v22 = vld [vmem:[#allocation19_spill] sm:$0xff] }
 0x1c0   :  { %v5562_v49 = vld [vmem:[#allocation20_spill] sm:$0xff]  ;;  %v3902_v39 = vld [vmem:[%s5443_s5 + $0x50] sm:$0xff]  }
 0x1c1   :  { %v1432_v45 = vmax.f32 %v1428_v35, 0.0  ;;  %v5563_v35 = vld [vmem:[#allocation21_spill] sm:$0xff] }
 0x1c3   :  { %v1434_v15 = vmax.f32 %v1431_v44, %v1432_v45  ;;  %v5564_v44 = vld [vmem:[#allocation28_spill] sm:$0xff]  ;;  %v5565_v45 = vld [vmem:[#allocation30_spill] sm:$0xff] }
 0x1c5   :  { %v5044_v52 = vpack.c.bf16 %v1434_v15, %v1433_v13  ;;  %v5566_v13 = vld [vmem:[#allocation31_spill] sm:$0xff]  ;;  %v5567_v15 = vld [vmem:[#allocation32_spill] sm:$0xff] }
 0x1c7   :  { %1582 = vmatmul.mubr.bf16.vlgmr.msra.gmra.mxu0 %v5044_v52  ;;  %v1880_v11 = vrot.slane %v5044_v52, 1  ;;  %v2335_v41 = vrot.slane %v5044_v52, 2 }
 0x1c8   :  { %1816 = vmatpush1.bf16.msra.mxu0 %v5042_v29  ;;  %1847 = vmatprep.mubr.bf16.mxu0 %v5499_v28 }
 0x1c9   :  { %1995 = vmatmul.mubr.bf16.vlgmr.msra.gmra.mxu1 %v1880_v11  ;;  %1817 = vmatprep.subr.bf16.mxu0 %v5049_v50 }
 0x1ca   :  { %2156 = vmatpush1.bf16.msra.mxu1 %v4801_v54  ;;  %2187 = vmatprep.mubr.bf16.mxu1 %v5499_v28  ;;  %v3852_v54 = vld [vmem:[%s5441_s3 + $0x140] ss:$8 sps:$4 sm:$0xff]  }
 0x1cb   :  { %2157 = vmatprep.subr.bf16.mxu1 %v4816_v57  ;;  %v3857_v57 = vld [vmem:[%s5441_s3 + $0x134] ss:$8 sps:$4 sm:$0xff]  }
 0x1cc   :  { %1818 = vmatpush1.bf16.msra.mxu0 %v5057_v34 }
 0x1cd   :  { %1819 = vmatprep.subr.bf16.mxu0 %v3851_v37 }
 0x1ce   :  { %2158 = vmatpush1.bf16.msra.mxu1 %v4826_v60  ;;  %v3855_v60 = vld [vmem:[%s5441_s3 + $0x130] ss:$8 sps:$4 sm:$0xff]  }
 0x1cf   :  { %2159 = vmatprep.subr.bf16.mxu1 %v4832_v61  ;;  %v3860_v61 = vld [vmem:[%s5441_s3 + $0x124] ss:$8 sps:$4 sm:$0xff]  }
 0x1d0   :  { %1820 = vmatpush1.bf16.msra.mxu0 %v3849_v58 }
 0x1d1   :  { %1821 = vmatprep.subr.bf16.mxu0 %v3854_v40 }
 0x1d2   :  { %2160 = vmatpush1.bf16.msra.mxu1 %v4840_v27  ;;  %v3858_v27 = vld [vmem:[%s5441_s3 + $0x120] ss:$8 sps:$4 sm:$0xff]  }
 0x1d3   :  { %2161 = vmatprep.subr.bf16.mxu1 %v4847_v5  ;;  %v3863_v5 = vld [vmem:[%s5441_s3 + $0x114] ss:$8 sps:$4 sm:$0xff]  }
 0x1d4   :  { %1822 = vmatpush1.bf16.msra.mxu0 %v3852_v54 }
 0x1d5   :  { %1823 = vmatprep.subr.bf16.mxu0 %v3857_v57 }
 0x1d6   :  { %2162 = vmatpush1.bf16.msra.mxu1 %v4852_v6  ;;  %v3861_v6 = vld [vmem:[%s5441_s3 + $0x110] ss:$8 sps:$4 sm:$0xff]  }
 0x1d7   :  { %2163 = vmatprep.subr.bf16.mxu1 %v4859_v10  ;;  %v3866_v10 = vld [vmem:[%s5441_s3 + $0x104] ss:$8 sps:$4 sm:$0xff]  }
 0x1d8   :  { %1824 = vmatpush1.bf16.msra.mxu0 %v3855_v60 }
 0x1d9   :  { %1825 = vmatprep.subr.bf16.mxu0 %v3860_v61 }
 0x1da   :  { %2164 = vmatpush1.bf16.msra.mxu1 %v4864_v12  ;;  %v3864_v12 = vld [vmem:[%s5441_s3 + $0x100] ss:$8 sps:$4 sm:$0xff]  }
 0x1db   :  { %2165 = vmatprep.subr.bf16.mxu1 %v4875_v51  ;;  %v3869_v51 = vld [vmem:[%s5441_s3 + $0x274] ss:$8 sps:$4 sm:$0xff]  }
 0x1dc   :  { %1826 = vmatpush1.bf16.msra.mxu0 %v3858_v27 }
 0x1dd   :  { %1827 = vmatprep.subr.bf16.mxu0 %v3863_v5 }
 0x1de   :  { %2166 = vmatpush1.bf16.msra.mxu1 %v4880_v30  ;;  %v3867_v30 = vld [vmem:[%s5441_s3 + $0x270] ss:$8 sps:$4 sm:$0xff]  }
 0x1df   :  { %2167 = vmatprep.subr.bf16.mxu1 %v5541_v46  ;;  %v3896_v46 = vld [vmem:[%s5443_s5 + $0x68] sm:$0xff]  }
 0x1e0   :  { %1828 = vmatpush1.bf16.msra.mxu0 %v3861_v6 }
 0x1e1   :  { %1829 = vmatprep.subr.bf16.mxu0 %v3866_v10 }
 0x1e2   :  { %2168 = vmatpush1.bf16.msra.mxu1 %v5542_v62  ;;  %v3899_v62 = vld [vmem:[%s5443_s5 + $0x18] sm:$0xff]  }
 0x1e3   :  { %2169 = vmatprep.subr.bf16.mxu1 %v5543_v4  ;;  %v3900_v4 = vld [vmem:[%s5443_s5 + $0x58] sm:$0xff]  }
 0x1e4   :  { %1830 = vmatpush1.bf16.msra.mxu0 %v3864_v12 }
 0x1e5   :  { %2108 = vmatprep.subr.bf16.mxu0 %v3869_v51 }
 0x1e6   :  { %2170 = vmatpush1.bf16.msra.mxu1 %v5545_v56  ;;  %v3905_v56 = vld [vmem:[%s5443_s5] sm:$0xff]  }
 0x1e7   :  { %1848 = vmatmul.mubr.bf16.vlgmr.msra.gmra.mxu0 %v1733_v32  ;;  %2241 = vmatprep.subr.bf16.mxu1 %v5546_v55  ;;  %v3906_v55 = vld [vmem:[%s5443_s5 + $0x40] sm:$0xff]  }
 0x1e8   :  { %2109 = vmatpush1.bf16.msra.mxu0 %v3867_v30  ;;  %2140 = vmatprep.mubr.bf16.mxu0 %v5499_v28 }
 0x1e9   :  { %2188 = vmatmul.mubr.bf16.vlgmr.msra.gmra.mxu1 %v1733_v32  ;;  %2110 = vmatprep.subr.bf16.mxu0 %v3872_v43  ;;  %v3903_v32 = vld [vmem:[%s5443_s5 + $0x8] sm:$0xff]  }
 0x1ea   :  { %2242 = vmatpush1.bf16.msra.mxu1 %v5042_v29  ;;  %2273 = vmatprep.mubr.bf16.mxu1 %v5499_v28  ;;  %v5568_v29 = vld [vmem:[#allocation33_spill] sm:$0xff] }
 0x1eb   :  { %2243 = vmatprep.subr.bf16.mxu1 %v5049_v50  ;;  %v5569_v50 = vld [vmem:[#allocation34_spill] sm:$0xff] }
 0x1ec   :  { %2111 = vmatpush1.bf16.msra.mxu0 %v3870_v47 }
 0x1ed   :  { %2112 = vmatprep.subr.bf16.mxu0 %v3875_v38 }
 0x1ee   :  { %2244 = vmatpush1.bf16.msra.mxu1 %v5057_v34  ;;  %v5571_v34 = vld [vmem:[#allocation36_spill] sm:$0xff] }
 0x1ef   :  { %2245 = vmatprep.subr.bf16.mxu1 %v3851_v37  ;;  %v5573_v37 = vld [vmem:[#allocation38_spill] sm:$0xff] }
 0x1f0   :  { %2113 = vmatpush1.bf16.msra.mxu0 %v3873_v53 }
 0x1f1   :  { %2114 = vmatprep.subr.bf16.mxu0 %v3878_v17 }
 0x1f2   :  { %2246 = vmatpush1.bf16.msra.mxu1 %v3849_v58  ;;  %v5575_v58 = vld [vmem:[#allocation40_spill] sm:$0xff] }
 0x1f3   :  { %2247 = vmatprep.subr.bf16.mxu1 %v3854_v40  ;;  %v5576_v40 = vld [vmem:[#allocation41_spill] sm:$0xff] }
 0x1f4   :  { %2115 = vmatpush1.bf16.msra.mxu0 %v3876_v3 }
 0x1f5   :  { %2116 = vmatprep.subr.bf16.mxu0 %v3881_v63 }
 0x1f6   :  { %2248 = vmatpush1.bf16.msra.mxu1 %v3852_v54  ;;  %v5577_v54 = vld [vmem:[#allocation42_spill] sm:$0xff] }
 0x1f7   :  { %2249 = vmatprep.subr.bf16.mxu1 %v3857_v57  ;;  %v5578_v57 = vld [vmem:[#allocation43_spill] sm:$0xff] }
 0x1f8   :  { %2117 = vmatpush1.bf16.msra.mxu0 %v3879_v9 }
 0x1f9   :  { %2118 = vmatprep.subr.bf16.mxu0 %v3884_v59 }
 0x1fa   :  { %2250 = vmatpush1.bf16.msra.mxu1 %v3855_v60  ;;  %v3891_v60 = vld [vmem:[%s5443_s5 + $0x38] sm:$0xff]  }
 0x1fb   :  { %2251 = vmatprep.subr.bf16.mxu1 %v3860_v61  ;;  %v3892_v61 = vld [vmem:[%s5443_s5 + $0x78] sm:$0xff]  }
 0x1fc   :  { %2119 = vmatpush1.bf16.msra.mxu0 %v3882_v31 }
 0x1fd   :  { %2120 = vmatprep.subr.bf16.mxu0 %v3887_v8 }
 0x1fe   :  { %2252 = vmatpush1.bf16.msra.mxu1 %v3858_v27  ;;  %v3972_v27 = vmov 0.0  }
 0x1ff   :  { %2253 = vmatprep.subr.bf16.mxu1 %v3863_v5  ;;  %v3893_v5 = vld [vmem:[%s5443_s5 + $0x30] sm:$0xff]  }
 0x200   :  { %2121 = vmatpush1.bf16.msra.mxu0 %v3885_v14 }
 0x201   :  { %2122 = vmatprep.subr.bf16.mxu0 %v3890_v0 }
 0x202   :  { %2254 = vmatpush1.bf16.msra.mxu1 %v3861_v6  ;;  %v3894_v6 = vld [vmem:[%s5443_s5 + $0x70] sm:$0xff]  }
 0x203   :  { %2255 = vmatprep.subr.bf16.mxu1 %v3866_v10  ;;  %v3895_v10 = vld [vmem:[%s5443_s5 + $0x28] sm:$0xff]  }
 0x204   :  { %2123 = vmatpush1.bf16.msra.mxu0 %v3888_v25 }
 0x205   :  { %2198 = vmatprep.subr.bf16.mxu0 %v5547_v7 }
 0x206   :  { %2256 = vmatpush1.bf16.msra.mxu1 %v3864_v12  ;;  %v3897_v12 = vld [vmem:[%s5443_s5 + $0x20] sm:$0xff]  }
 0x207   :  { %2141 = vmatmul.mubr.bf16.vlgmr.msra.gmra.mxu0 %v2026_v36  ;;  %2337 = vmatprep.subr.bf16.mxu1 %v3869_v51  ;;  %v3898_v51 = vld [vmem:[%s5443_s5 + $0x60] sm:$0xff]  }
 0x208   :  { %2199 = vmatpush1.bf16.msra.mxu0 %v5548_v26  ;;  %2230 = vmatprep.mubr.bf16.mxu0 %v5499_v28 }
 0x209   :  { %2274 = vmatmul.mubr.bf16.vlgmr.msra.gmra.mxu1 %v1880_v11  ;;  %2200 = vmatprep.subr.bf16.mxu0 %v5549_v23  ;;  %v5570_v11 = vld [vmem:[#allocation35_spill] sm:$0xff] }
 0x20a   :  { %2338 = vmatpush1.bf16.msra.mxu1 %v3867_v30  ;;  %2369 = vmatprep.mubr.bf16.mxu1 %v5499_v28  ;;  %v3901_v30 = vld [vmem:[%s5443_s5 + $0x10] sm:$0xff]  }
 0x20b   :  { %2339 = vmatprep.subr.bf16.mxu1 %v3872_v43  ;;  %v3904_v43 = vld [vmem:[%s5443_s5 + $0x48] sm:$0xff]  }
 0x20c   :  { %2201 = vmatpush1.bf16.msra.mxu0 %v5550_v16 }
 0x20d   :  { %2202 = vmatprep.subr.bf16.mxu0 %v5551_v20 }
 0x20e   :  { %2340 = vmatpush1.bf16.msra.mxu1 %v3870_v47 }
 0x20f   :  { %2341 = vmatprep.subr.bf16.mxu1 %v3875_v38  ;;  %v1706_v47 = vpop.f32.mrf.mxu1 }
 0x210   :  { %2203 = vmatpush1.bf16.msra.mxu0 %v5552_v19 }
 0x211   :  { %2204 = vmatprep.subr.bf16.mxu0 %v5553_v24  ;;  %v1708_v38 = vpop.f32.mrf.mxu1 }
 0x212   :  { %2342 = vmatpush1.bf16.msra.mxu1 %v3873_v53 }
 0x213   :  { %2343 = vmatprep.subr.bf16.mxu1 %v3878_v17  ;;  %v1710_v17 = vpop.f32.mrf.mxu1 }
 0x214   :  { %2205 = vmatpush1.bf16.msra.mxu0 %v5554_v42 }
 0x215   :  { %2206 = vmatprep.subr.bf16.mxu0 %v5555_v21 }
 0x216   :  { %2344 = vmatpush1.bf16.msra.mxu1 %v3876_v3 }
 0x217   :  { %2345 = vmatprep.subr.bf16.mxu1 %v3881_v63  ;;  %v1712_v63 = vpop.f32.mrf.mxu1 }
 0x218   :  { %2207 = vmatpush1.bf16.msra.mxu0 %v5556_v2 }
 0x219   :  { %2208 = vmatprep.subr.bf16.mxu0 %v5557_v33 }
 0x21a   :  { %2346 = vmatpush1.bf16.msra.mxu1 %v3879_v9 }
 0x21b   :  { %2347 = vmatprep.subr.bf16.mxu1 %v3884_v59 }
 0x21c   :  { %2209 = vmatpush1.bf16.msra.mxu0 %v5558_v18 }
 0x21d   :  { %2210 = vmatprep.subr.bf16.mxu0 %v5559_v1 }
 0x21e   :  { %2348 = vmatpush1.bf16.msra.mxu1 %v3882_v31 }
 0x21f   :  { %2349 = vmatprep.subr.bf16.mxu1 %v3887_v8 }
 0x220   :  { %2211 = vmatpush1.bf16.msra.mxu0 %v5560_v48 }
 0x221   :  { %2212 = vmatprep.subr.bf16.mxu0 %v5561_v22 }
 0x222   :  { %2350 = vmatpush1.bf16.msra.mxu1 %v3885_v14 }
 0x223   :  { %2351 = vmatprep.subr.bf16.mxu1 %v3890_v0 }
 0x224   :  { %2213 = vmatpush1.bf16.msra.mxu0 %v5562_v49 }
 0x225   :  { %2288 = vmatprep.subr.bf16.mxu0 %v5563_v35 }
 0x226   :  { %2352 = vmatpush1.bf16.msra.mxu1 %v3888_v25 }
 0x227   :  { %2231 = vmatmul.mubr.bf16.vlgmr.msra.gmra.mxu0 %v5044_v52  ;;  %v5572_v52 = vld [vmem:[#allocation37_spill] sm:$0xff]  ;;  %3569 = vmatprep.subr.bf16.mxu1 %v3972_v27 }
 0x228   :  { %2289 = vmatpush1.bf16.msra.mxu0 %v5564_v44  ;;  %2320 = vmatprep.mubr.bf16.mxu0 %v5499_v28  ;;  %v5574_v28 = vld [vmem:[#allocation39_spill] sm:$0xff] }
 0x229   :  { %2370 = vmatmul.mubr.bf16.vlgmr.msra.gmra.mxu1 %v2335_v41  ;;  %2290 = vmatprep.subr.bf16.mxu0 %v5565_v45 }
 0x22a   :  { %3570 = vmatpush3.bf16.msra.mxu1 %v3891_v60  ;;  %3585 = vmatprep.mubr.msk.bf16.mxu1 %vm3973_vm1, %v3972_v27 }
 0x22b   :  { %3571 = vmatprep.subr.bf16.mxu1 %v3972_v27 }
 0x22c   :  { %2291 = vmatpush1.bf16.msra.mxu0 %v5566_v13 }
 0x22d   :  { %2292 = vmatprep.subr.bf16.mxu0 %v5567_v15 }
 0x22e   :  { %3572 = vmatpush3.bf16.msra.mxu1 %v3893_v5 }
 0x22f   :  { %3573 = vmatprep.subr.bf16.mxu1 %v3972_v27 }
 0x230   :  { %2293 = vmatpush1.bf16.msra.mxu0 %v5568_v29 }
 0x231   :  { %2294 = vmatprep.subr.bf16.mxu0 %v5569_v50 }
 0x232   :  { %3574 = vmatpush3.bf16.msra.mxu1 %v3895_v10 }
 0x233   :  { %3575 = vmatprep.subr.bf16.mxu1 %v3972_v27 }
 0x234   :  { %2295 = vmatpush1.bf16.msra.mxu0 %v5570_v11 }
 0x235   :  { %2296 = vmatprep.subr.bf16.mxu0 %v5571_v34 }
 0x236   :  { %3576 = vmatpush3.bf16.msra.mxu1 %v3897_v12 }
 0x237   :  { %3577 = vmatprep.subr.bf16.mxu1 %v3972_v27 }
 0x238   :  { %2297 = vmatpush1.bf16.msra.mxu0 %v5572_v52 }
 0x239   :  { %2298 = vmatprep.subr.bf16.mxu0 %v5573_v37 }
 0x23a   :  { %3578 = vmatpush3.bf16.msra.mxu1 %v3899_v62 }
 0x23b   :  { %3579 = vmatprep.subr.bf16.mxu1 %v3972_v27 }
 0x23c   :  { %2299 = vmatpush1.bf16.msra.mxu0 %v5574_v28 }
 0x23d   :  { %2300 = vmatprep.subr.bf16.mxu0 %v5575_v58 }
 0x23e   :  { %3580 = vmatpush3.bf16.msra.mxu1 %v3901_v30 }
 0x23f   :  { %3581 = vmatprep.subr.bf16.mxu1 %v3972_v27 }
 0x240   :  { %2301 = vmatpush1.bf16.msra.mxu0 %v5576_v40 }
 0x241   :  { %2302 = vmatprep.subr.bf16.mxu0 %v5577_v54 }
 0x242   :  { %3582 = vmatpush3.bf16.msra.mxu1 %v3903_v32 }
 0x243   :  { %3583 = vmatprep.subr.bf16.mxu1 %v3972_v27 }
 0x244   :  { %2303 = vmatpush1.bf16.msra.mxu0 %v5578_v57 }
 0x245   :  { %3549 = vmatprep.subr.bf16.mxu0 %v3972_v27 }
 0x246   :  { %3584 = vmatpush3.bf16.msra.mxu1 %v3905_v56 }
 0x247   :  { %2321 = vmatmul.mubr.bf16.vlgmr.msra.gmra.mxu0 %v2026_v36  ;;  %3609 = vmatprep.subr.bf16.mxu1 %v3972_v27 }
 0x248   :  { %3550 = vmatpush3.bf16.msra.mxu0 %v3892_v61  ;;  %3565 = vmatprep.mubr.msk.bf16.mxu0 %vm3973_vm1, %v3972_v27 }
 0x249   :  { %3551 = vmatprep.subr.bf16.mxu0 %v3972_v27 }
 0x24c   :  { %3552 = vmatpush3.bf16.msra.mxu0 %v3894_v6 }
 0x24d   :  { %3553 = vmatprep.subr.bf16.mxu0 %v3972_v27 }
 0x250   :  { %3554 = vmatpush3.bf16.msra.mxu0 %v3896_v46 }
 0x251   :  { %3555 = vmatprep.subr.bf16.mxu0 %v3972_v27 }
 0x254   :  { %3556 = vmatpush3.bf16.msra.mxu0 %v3898_v51  ;;  %v2388_v51 = vld [vmem:[%s5442_s4] sm:$0x3] }
 0x255   :  { %3557 = vmatprep.subr.bf16.mxu0 %v3972_v27 }
 0x258   :  { %3558 = vmatpush3.bf16.msra.mxu0 %v3900_v4 }
 0x259   :  { %3559 = vmatprep.subr.bf16.mxu0 %v3972_v27 }
 0x25c   :  { %3560 = vmatpush3.bf16.msra.mxu0 %v3902_v39 }
 0x25d   :  { %3561 = vmatprep.subr.bf16.mxu0 %v3972_v27 }
 0x260   :  { %3562 = vmatpush3.bf16.msra.mxu0 %v3904_v43  ;;  %v5579_v43 = vld [vmem:[#allocation22_spill] sm:$0xff] }
 0x261   :  { %3563 = vmatprep.subr.bf16.mxu0 %v3972_v27  ;;  %v5580_v56 = vsub.s32 1, %v5579_v43 }
 0x264   :  { %3564 = vmatpush3.bf16.msra.mxu0 %v3906_v55  ;;  %v2397_v55 = vrot.slane %v2388_v51, %v5580_v56  ;;  %v3933_v56 = vld [vmem:[%s5445_s7 + $0x28] sm:$0xff]  }
 0x265   :  { %3589 = vmatprep.subr.bf16.mxu0 %v3972_v27 }
 0x287   :  { %v1583_v53 = vpop.f32.mrf.mxu0 }
 0x288   :  { %v1707_v44 = vadd.f32 %v1706_v47, %v1583_v53 }
 0x289   :  { %v1585_v3 = vpop.f32.mrf.mxu0  ;;  %v1996_v59 = vpop.f32.mrf.mxu1 }
 0x28a   :  { %v1709_v13 = vadd.f32 %v1708_v38, %v1585_v3 }
 0x28b   :  { %v1587_v9 = vpop.f32.mrf.mxu0  ;;  %v1998_v8 = vpop.f32.mrf.mxu1 }
 0x28c   :  { %v1711_v29 = vadd.f32 %v1710_v17, %v1587_v9 }
 0x28d   :  { %v1589_v31 = vpop.f32.mrf.mxu0  ;;  %v2000_v0 = vpop.f32.mrf.mxu1 }
 0x28e   :  { %v1713_v28 = vadd.f32 %v1712_v63, %v1589_v31 }
 0x28f   :  { %v2002_v36 = vpop.f32.mrf.mxu1 }
 0x2a7   :  { %v1849_v14 = vpop.f32.mrf.mxu0 }
 0x2a8   :  { %v1858_v50 = vadd.f32 %v1849_v14, %v1707_v44 }
 0x2a9   :  { %v1851_v25 = vpop.f32.mrf.mxu0  ;;  %v2189_v26 = vpop.f32.mrf.mxu1 }
 0x2aa   :  { %v1859_v34 = vadd.f32 %v1851_v25, %v1709_v13  ;;  %v2005_v6 = vadd.f32 %v1996_v59, %v1858_v50  ;;  %v5581_v59 = vsub.s32 0, %v5579_v43  ;;  %v3910_v13 = vld [vmem:[%s5443_s5 + $0xb0] sm:$0xff]   ;;  %v3913_v50 = vld [vmem:[%s5443_s5 + $0xe0] sm:$0xff]  }
 0x2ab   :  { %v1853_v7 = vpop.f32.mrf.mxu0  ;;  %v2191_v16 = vpop.f32.mrf.mxu1  ;;  %v3932_v43 = vld [vmem:[%s5445_s7 + $0x30] sm:$0xff]  }
 0x2ac   :  { %v1860_v58 = vadd.f32 %v1853_v7, %v1711_v29  ;;  %v2006_v46 = vadd.f32 %v1998_v8, %v1859_v34  ;;  %v2393_v31 = vrot.slane %v2388_v51, %v5581_v59  ;;  %v3912_v29 = vld [vmem:[%s5443_s5 + $0xa8] sm:$0xff]   ;;  %v3915_v34 = vld [vmem:[%s5443_s5 + $0xd8] sm:$0xff]   ;;  %v3928_v51 = vld [vmem:[%s5443_s5 + $0x110] sm:$0xff]  }
 0x2ad   :  { %v1855_v23 = vpop.f32.mrf.mxu0  ;;  %v2193_v19 = vpop.f32.mrf.mxu1 }
 0x2ae   :  { %v1861_v5 = vadd.f32 %v1855_v23, %v1713_v28  ;;  %v2007_v39 = vadd.f32 %v2000_v0, %v1860_v58  ;;  %v3918_v28 = vld [vmem:[%s5443_s5 + $0x90] sm:$0xff]   ;;  %v3919_v58 = vld [vmem:[%s5443_s5 + $0xc8] sm:$0xff]  }
 0x2af   :  { %v2195_v42 = vpop.f32.mrf.mxu1 }
 0x2b0   :  { %v2008_v9 = vadd.f32 %v2002_v36, %v1861_v5 }
 0x2c7   :  { %v2142_v20 = vpop.f32.mrf.mxu0 }
 0x2c8   :  { %v2151_v30 = vadd.f32 %v2142_v20, %v2005_v6  ;;  %v3924_v6 = vld [vmem:[%s5443_s5 + $0x130] sm:$0xff]  }
 0x2c9   :  { %v2144_v24 = vpop.f32.mrf.mxu0  ;;  %v2275_v2 = vpop.f32.mrf.mxu1 }
 0x2ca   :  { %v2152_v38 = vadd.f32 %v2144_v24, %v2006_v46  ;;  %v3926_v46 = vld [vmem:[%s5443_s5 + $0x120] sm:$0xff]  }
 0x2cb   :  { %v2146_v21 = vpop.f32.mrf.mxu0  ;;  %v2277_v18 = vpop.f32.mrf.mxu1 }
 0x2cc   :  { %v2153_v63 = vadd.f32 %v2146_v21, %v2007_v39  ;;  %v3931_v39 = vld [vmem:[%s5445_s7 + $0x38] ss:$0 sps:$4 sm:$0xff]  }
 0x2cd   :  { %v2148_v33 = vpop.f32.mrf.mxu0  ;;  %v2279_v48 = vpop.f32.mrf.mxu1 }
 0x2ce   :  { %v2154_v23 = vadd.f32 %v2148_v33, %v2008_v9  ;;  %v3908_v33 = vld [vmem:[%s5443_s5 + $0xb8] sm:$0xff]  }
 0x2cf   :  { %v2281_v49 = vpop.f32.mrf.mxu1 }
 0x2e7   :  { %v2232_v1 = vpop.f32.mrf.mxu0 }
 0x2e8   :  { %v2233_v41 = vadd.f32 %v2232_v1, %v2189_v26 }
 0x2e9   :  { %v2234_v22 = vpop.f32.mrf.mxu0  ;;  %v2371_v45 = vpop.f32.mrf.mxu1 }
 0x2ea   :  { %v2235_v15 = vadd.f32 %v2234_v22, %v2191_v16  ;;  %v2284_v37 = vadd.f32 %v2275_v2, %v2233_v41 }
 0x2eb   :  { %v2236_v35 = vpop.f32.mrf.mxu0  ;;  %v2373_v40 = vpop.f32.mrf.mxu1 }
 0x2ec   :  { %v2237_v52 = vadd.f32 %v2236_v35, %v2193_v19  ;;  %v2285_v61 = vadd.f32 %v2277_v18, %v2235_v15  ;;  %v3907_v35 = vld [vmem:[%s5443_s5 + $0xf8] sm:$0xff]   ;;  %v3911_v15 = vld [vmem:[%s5443_s5 + $0xe8] sm:$0xff]  }
 0x2ed   :  { %v2238_v11 = vpop.f32.mrf.mxu0  ;;  %v2375_v32 = vpop.f32.mrf.mxu1 }
 0x2ee   :  { %v2239_v57 = vadd.f32 %v2238_v11, %v2195_v42  ;;  %v2286_v4 = vadd.f32 %v2279_v48, %v2237_v52  ;;  %v3914_v11 = vld [vmem:[%s5443_s5 + $0xa0] sm:$0xff]   ;;  %v3916_v52 = vld [vmem:[%s5443_s5 + $0x98] sm:$0xff]  }
 0x2ef   :  { %v2377_v0 = vpop.f32.mrf.mxu1 }
 0x2f0   :  { %v2287_v3 = vadd.f32 %v2281_v49, %v2239_v57  ;;  %v3922_v57 = vld [vmem:[%s5443_s5 + $0x80] sm:$0xff]  }
 0x307   :  { %v2322_v54 = vpop.f32.mrf.mxu0 }
 0x308   :  { %v2331_v60 = vadd.f32 %v2322_v54, %v2284_v37  ;;  %v3917_v37 = vld [vmem:[%s5443_s5 + $0xd0] sm:$0xff]   ;;  %v3921_v54 = vld [vmem:[%s5443_s5 + $0xc0] sm:$0xff]  }
 0x309   :  { %v2324_v10 = vpop.f32.mrf.mxu0 }
 0x30a   :  { %v2380_v12 = vadd.f32 %v2371_v45, %v2331_v60  ;;  %v2332_v62 = vadd.f32 %v2324_v10, %v2285_v61  ;;  %v3909_v45 = vld [vmem:[%s5443_s5 + $0xf0] sm:$0xff]   ;;  %v3923_v61 = vld [vmem:[%s5443_s5 + $0x138] sm:$0xff]   ;;  %v3925_v10 = vld [vmem:[%s5443_s5 + $0x128] sm:$0xff]  }
 0x30b   :  { %v2326_v47 = vpop.f32.mrf.mxu0 }
 0x30c   :  { %v2381_v53 = vadd.f32 %v2373_v40, %v2332_v62  ;;  %v2333_v17 = vadd.f32 %v2326_v47, %v2286_v4  ;;  %v2384_v14 = vmax.f32 %v2151_v30, %v2380_v12  ;;  %v3920_v40 = vld [vmem:[%s5443_s5 + $0x88] sm:$0xff]   ;;  %v3927_v12 = vld [vmem:[%s5443_s5 + $0x118] sm:$0xff]   ;;  %v3930_v4 = vld [vmem:[%s5443_s5 + $0x100] sm:$0xff]  }
 0x30d   :  { %v2328_v8 = vpop.f32.mrf.mxu0  ;;  %v3929_v62 = vld [vmem:[%s5443_s5 + $0x108] sm:$0xff]   ;;  %v3935_v47 = vld [vmem:[%s5445_s7 + $0x18] sm:$0xff]  }
 0x30e   :  { %v2385_v25 = vmax.f32 %v2152_v38, %v2381_v53  ;;  %v2382_v7 = vadd.f32 %v2375_v32, %v2333_v17  ;;  %v2334_v26 = vadd.f32 %v2328_v8, %v2287_v3  ;;  %v2400_v42 = vadd.f32 %v2393_v31, %v2384_v14  ;;  %v3936_v38 = vld [vmem:[%s5445_s7 + $0x10] sm:$0xff]   ;;  %v3937_v53 = vld [vmem:[%s5445_s7 + $0x8] sm:$0xff]   ;;  %v3938_v17 = vld [vmem:[%s5445_s7] sm:$0xff]  }
 0x30f   :  { %v3030_v32 = vsel %vm3028_vm2, %v3931_v39, 0 }
 0x310   :  { %v2401_v16 = vadd.f32 %v2397_v55, %v2385_v25  ;;  %v2386_v20 = vmax.f32 %v2153_v63, %v2382_v7  ;;  %v2383_v19 = vadd.f32 %v2377_v0, %v2334_v26  ;;  %v2404_v21 = vmax.f32 %v2400_v42, 0.0 }
 0x312   :  { %v2402_v24 = vadd.f32 %v2393_v31, %v2386_v20  ;;  %v2387_v2 = vmax.f32 %v2154_v23, %v2383_v19  ;;  %v2405_v18 = vmax.f32 %v2401_v16, 0.0 }
 0x314   :  { %v2403_v1 = vadd.f32 %v2397_v55, %v2387_v2  ;;  %v2406_v36 = vmax.f32 %v2402_v24, 0.0  ;;  %v2408_v22 = vmax.f32 %v2404_v21, %v2405_v18  ;;  %v3934_v55 = vld [vmem:[%s5445_s7 + $0x20] sm:$0xff]  }
 0x316   :  { %v2407_v48 = vmax.f32 %v2403_v1, 0.0  ;;  %v3484_v1 = vld [vmem:[%s5444_s6] ss:$0 sm:$0xff]  ;;  %s3949_s6 = scalar_lea.vmem %s3081_s2, 32 }
 0x317   :  { %p3950_p0 = scmp.ne.s32.totalorder %s3081_s2, %s3949_s6  ;;  %p3955_p2 = scmp.lt.s32.totalorder %s3949_s6, %s3949_s6 }
 0x318   :  { %v2409_v49 = vmax.f32 %v2406_v36, %v2407_v48 }
 0x319   :  { %p3956_p3 = por %p3955_p2, %p3954_p1 }
 0x31a   :  { %v5291_v41 = vpack.c.bf16 %v2409_v49, %v2408_v22 }
 0x31b   :  { %p3957_p4 = pnand %p3956_p3, %p3950_p0 }
 0x31c   :  { %3586 = vmatmul.mubr.bf16.vlgmr.msra.gmra.mxu1 %v5291_v41  ;;  %v2445_v44 = vrot.slane %v5291_v41, 1  ;;  %v2748_v60 = vrot.slane %v5291_v41, 3  ;;  %v2640_v5 = vrot.slane %v5291_v41, 2  ;;  %v2856_v30 = vrot.slane %v5291_v41, 4 }
 0x31d   :  { %3610 = vmatpush3.bf16.msra.mxu1 %v3907_v35  ;;  %3625 = vmatprep.mubr.msk.bf16.mxu1 %vm3973_vm1, %v3972_v27 }
 0x31e   :  { %3566 = vmatmul.mubr.bf16.vlgmr.msra.gmra.mxu0 %v2445_v44  ;;  %3611 = vmatprep.subr.bf16.mxu1 %v3972_v27 }
 0x31f   :  { %3590 = vmatpush3.bf16.msra.mxu0 %v3908_v33  ;;  %3605 = vmatprep.mubr.msk.bf16.mxu0 %vm3973_vm1, %v3972_v27  ;;  %v3485_v33 = vld [vmem:[%s5446_s8] ss:$0 sm:$0xff] }
 0x320   :  { %3591 = vmatprep.subr.bf16.mxu0 %v3972_v27 }
 0x321   :  { %3612 = vmatpush3.bf16.msra.mxu1 %v3909_v45 }
 0x322   :  { %3613 = vmatprep.subr.bf16.mxu1 %v3972_v27 }
 0x323   :  { %3592 = vmatpush3.bf16.msra.mxu0 %v3910_v13 }
 0x324   :  { %3593 = vmatprep.subr.bf16.mxu0 %v3972_v27 }
 0x325   :  { %3614 = vmatpush3.bf16.msra.mxu1 %v3911_v15 }
 0x326   :  { %3615 = vmatprep.subr.bf16.mxu1 %v3972_v27 }
 0x327   :  { %3594 = vmatpush3.bf16.msra.mxu0 %v3912_v29 }
 0x328   :  { %3595 = vmatprep.subr.bf16.mxu0 %v3972_v27 }
 0x329   :  { %3616 = vmatpush3.bf16.msra.mxu1 %v3913_v50 }
 0x32a   :  { %3617 = vmatprep.subr.bf16.mxu1 %v3972_v27 }
 0x32b   :  { %3596 = vmatpush3.bf16.msra.mxu0 %v3914_v11 }
 0x32c   :  { %3597 = vmatprep.subr.bf16.mxu0 %v3972_v27 }
 0x32d   :  { %3618 = vmatpush3.bf16.msra.mxu1 %v3915_v34 }
 0x32e   :  { %3619 = vmatprep.subr.bf16.mxu1 %v3972_v27 }
 0x32f   :  { %3598 = vmatpush3.bf16.msra.mxu0 %v3916_v52 }
 0x330   :  { %3599 = vmatprep.subr.bf16.mxu0 %v3972_v27 }
 0x331   :  { %3620 = vmatpush3.bf16.msra.mxu1 %v3917_v37 }
 0x332   :  { %3621 = vmatprep.subr.bf16.mxu1 %v3972_v27 }
 0x333   :  { %3600 = vmatpush3.bf16.msra.mxu0 %v3918_v28 }
 0x334   :  { %3601 = vmatprep.subr.bf16.mxu0 %v3972_v27 }
 0x335   :  { %3622 = vmatpush3.bf16.msra.mxu1 %v3919_v58 }
 0x336   :  { %3623 = vmatprep.subr.bf16.mxu1 %v3972_v27 }
 0x337   :  { %3602 = vmatpush3.bf16.msra.mxu0 %v3920_v40 }
 0x338   :  { %3603 = vmatprep.subr.bf16.mxu0 %v3972_v27 }
 0x339   :  { %3624 = vmatpush3.bf16.msra.mxu1 %v3921_v54 }
 0x33a   :  { %3649 = vmatprep.subr.bf16.mxu1 %v3972_v27 }
 0x33b   :  { %3604 = vmatpush3.bf16.msra.mxu0 %v3922_v57 }
 0x33c   :  { %3626 = vmatmul.mubr.bf16.vlgmr.msra.gmra.mxu1 %v2748_v60  ;;  %3629 = vmatprep.subr.bf16.mxu0 %v3972_v27 }
 0x33d   :  { %3665 = vmatprep.mubr.msk.bf16.mxu1 %vm3973_vm1, %v3972_v27  ;;  %3650 = vmatpush3.bf16.msra.mxu1 %v3030_v32 }
 0x33e   :  { %3606 = vmatmul.mubr.bf16.vlgmr.msra.gmra.mxu0 %v2640_v5  ;;  %3651 = vmatprep.subr.bf16.mxu1 %v3972_v27 }
 0x33f   :  { %3630 = vmatpush3.bf16.msra.mxu0 %v3923_v61  ;;  %3645 = vmatprep.mubr.msk.bf16.mxu0 %vm3973_vm1, %v3972_v27 }
 0x340   :  { %3631 = vmatprep.subr.bf16.mxu0 %v3972_v27 }
 0x341   :  { %3652 = vmatpush3.bf16.msra.mxu1 %v3932_v43 }
 0x342   :  { %3653 = vmatprep.subr.bf16.mxu1 %v3972_v27 }
 0x343   :  { %3632 = vmatpush3.bf16.msra.mxu0 %v3924_v6 }
 0x344   :  { %3633 = vmatprep.subr.bf16.mxu0 %v3972_v27 }
 0x345   :  { %3654 = vmatpush3.bf16.msra.mxu1 %v3933_v56 }
 0x346   :  { %3655 = vmatprep.subr.bf16.mxu1 %v3972_v27 }
 0x347   :  { %3634 = vmatpush3.bf16.msra.mxu0 %v3925_v10 }
 0x348   :  { %3635 = vmatprep.subr.bf16.mxu0 %v3972_v27 }
 0x349   :  { %3656 = vmatpush3.bf16.msra.mxu1 %v3934_v55 }
 0x34a   :  { %3657 = vmatprep.subr.bf16.mxu1 %v3972_v27 }
 0x34b   :  { %3636 = vmatpush3.bf16.msra.mxu0 %v3926_v46 }
 0x34c   :  { %3637 = vmatprep.subr.bf16.mxu0 %v3972_v27 }
 0x34d   :  { %3658 = vmatpush3.bf16.msra.mxu1 %v3935_v47 }
 0x34e   :  { %3659 = vmatprep.subr.bf16.mxu1 %v3972_v27 }
 0x34f   :  { %3638 = vmatpush3.bf16.msra.mxu0 %v3927_v12 }
 0x350   :  { %3639 = vmatprep.subr.bf16.mxu0 %v3972_v27 }
 0x351   :  { %3660 = vmatpush3.bf16.msra.mxu1 %v3936_v38 }
 0x352   :  { %3661 = vmatprep.subr.bf16.mxu1 %v3972_v27 }
 0x353   :  { %3640 = vmatpush3.bf16.msra.mxu0 %v3928_v51 }
 0x354   :  { %3641 = vmatprep.subr.bf16.mxu0 %v3972_v27 }
 0x355   :  { %3662 = vmatpush3.bf16.msra.mxu1 %v3937_v53 }
 0x356   :  { %3663 = vmatprep.subr.bf16.mxu1 %v3972_v27 }
 0x357   :  { %3642 = vmatpush3.bf16.msra.mxu0 %v3929_v62 }
 0x358   :  { %3643 = vmatprep.subr.bf16.mxu0 %v3972_v27 }
 0x359   :  { %3664 = vmatpush3.bf16.msra.mxu1 %v3938_v17 }
 0x35b   :  { %3644 = vmatpush3.bf16.msra.mxu0 %v3930_v4 }
 0x35e   :  { %3646 = vmatmul.mubr.bf16.vlgmr.msra.gmra.mxu0 %v2856_v30 }
 0x3dc   :  { %v2617_v3 = vpop.f32.mrf.mxu1 }
 0x3de   :  { %v2529_v63 = vpop.f32.mrf.mxu0  ;;  %v3587_v9 = vpop.f32.mrf.mxu1 }
 0x3df   :  { %v2618_v42 = vadd.f32 %v2617_v3, %v2529_v63 }
 0x3e0   :  { %v3567_v59 = vpop.f32.mrf.mxu0  ;;  %v2620_v31 = vpop.f32.mrf.mxu1 }
 0x3e2   :  { %v2532_v8 = vpop.f32.mrf.mxu0  ;;  %v3588_v14 = vpop.f32.mrf.mxu1 }
 0x3e4   :  { %v3568_v25 = vpop.f32.mrf.mxu0 }
 0x3fc   :  { %v2832_v7 = vpop.f32.mrf.mxu1 }
 0x3fe   :  { %v2724_v26 = vpop.f32.mrf.mxu0  ;;  %v3627_v0 = vpop.f32.mrf.mxu1 }
 0x3ff   :  { %v2730_v24 = vadd.f32 %v2724_v26, %v2618_v42 }
 0x400   :  { %v3607_v23 = vpop.f32.mrf.mxu0  ;;  %v2835_v16 = vpop.f32.mrf.mxu1 }
 0x401   :  { %v2838_v2 = vadd.f32 %v2832_v7, %v2730_v24 }
 0x402   :  { %v2727_v20 = vpop.f32.mrf.mxu0  ;;  %v3628_v27 = vpop.f32.mrf.mxu1 }
 0x404   :  { %v3608_v19 = vpop.f32.mrf.mxu0 }
 0x41e   :  { %v2940_v18 = vpop.f32.mrf.mxu0 }
 0x41f   :  { %v2946_v21 = vadd.f32 %v2940_v18, %v2838_v2 }
 0x420   :  { %v3647_v36 = vpop.f32.mrf.mxu0 }
 0x421   :  { %v2954_v48 = vadd.f32 %v3484_v1, %v2946_v21 }
 0x422   :  { %v2943_v22 = vpop.f32.mrf.mxu0 }
 0x423   :  { %v2955_v49 = vmax.f32 %v2954_v48, 0.0 }
 0x424   :  { %v3648_v35 = vpop.f32.mrf.mxu0 }
 0x425   :  { %v2956_v41 = vpack.c.bf16 %v2955_v49, %v2955_v49 }
 0x427   :  { %3666 = vmatmul.mubr.msk.bf16.vlgmr.msra.gmra.mxu1 %vm3024_vm3, %v2956_v41 }
 0x4e7   :  { %v3066_v44 = vpop.f32.mrf.mxu1 }
 0x4e8   :  { %v3067_v45 = vadd.f32 %v3485_v33, %v3066_v44 }
 0x4e9   :  { %v3667_v13 = vpop.f32.mrf.mxu1 }
 0x4ea   :  { %3073 = vst.msk [vmem:[#allocation2] sm:$0x3] %vm3072_vm4, %v3067_v45 }
 0x4eb   :  { %v3069_v15 = vpop.f32.mrf.mxu1 }
 0x4ec   :  { %3960 = shalt.err (!%p3957_p4)
}
 0x4ed   :  { %3083 = dma.vmem_to_hbm [thread:$0]  %s3081_s2, 32, %s5447_s9, [#allocation3]   ;;  %v3668_v29 = vpop.f32.mrf.mxu1 }
 0x4ee   :  { %3969 = dma.done.wait [#allocation3], 32  }
 0x4ef   :  { %3970 = vsyncadd [#allocation3], 4294967264 }
 0x4f0   :  { %3087 = vsyncpa [#allocation3], 1 }

</bundles_post_ra>
